<compile_context>
chip_gen: v7x
topology: tpu7x:2x2x1
jax: 0.10.0
libtpu: 0.0.40
codegen_flags: <defaults>
</compile_context>

<pallas_src>
import jax
import jax.numpy as jnp
from jax.experimental import pallas as pl
from jax.experimental.pallas import tpu as pltpu


def _round_up(x, m):
    return (x + m - 1) // m * m


# --------------------------------------------------------------------------------------
# Fused TCN kernel: all TemporalBlock levels in one kernel body, Bb batch rows per step.
# --------------------------------------------------------------------------------------
def make_tcn_kernel(ksize, dilations, has_down, Bb, L, cin, cpad, pad_base):
    n_levels = len(dilations)

    def kernel(*refs):
        # ---- unpack refs: x, per-level weights, output, VMEM scratches ----------------
        x_ref = refs[0]
        idx = 1
        level_refs = []
        for hd in has_down:
            n = 6 if hd else 4
            level_refs.append(refs[idx:idx + n])
            idx += n
        o_ref = refs[idx]
        buf = refs[idx + 1]        # (Bb, pad_base + L, cpad) f32 activation scratch
        res_buf = refs[idx + 2]    # (Bb, L, cpad)            f32 residual scratch

        # Zero the whole activation buffer once (covers causal-pad rows AND the padded
        # channel tail), then write the unpadded input channels.  Only rows
        # [pad_base : pad_base+L) x [0:cpad) are overwritten afterwards, so every level's
        # dilated taps read true zeros from the pad region.
        buf[...] = jnp.zeros((Bb, pad_base + L, cpad), jnp.float32)
        buf[:, pad_base:pad_base + L, 0:cin] = x_ref[...]

        def causal_conv(w_ref, b_ref, dilation):
            # K accumulated MXU matmuls, one per dilated tap (static slice of the
            # front-padded buffer).  bf16 inputs, f32 accumulation.
            acc = None
            for j in range(ksize):
                start = pad_base - (ksize - 1 - j) * dilation   # static per level/tap
                tap = (buf[:, start:start + L, :]
                       .reshape(Bb * L, cpad).astype(jnp.bfloat16))
                part = jnp.dot(tap, w_ref[j], preferred_element_type=jnp.float32)
                acc = part if acc is None else acc + part
            return acc + b_ref[...]

        for lvl in range(n_levels):            # static unroll over levels
            d = dilations[lvl]
            if has_down[lvl]:
                w1, b1, w2, b2, wd, bd = level_refs[lvl]
            else:
                w1, b1, w2, b2 = level_refs[lvl]

            # Residual path goes to its own VMEM scratch before conv1 overwrites `buf`,
            # so no (Bb*L, cpad) f32 value stays live across two matmuls.
            x_cur = buf[:, pad_base:pad_base + L, :]
            if has_down[lvl]:                  # 1x1 conv residual projection
                res = jnp.dot(x_cur.reshape(Bb * L, cpad).astype(jnp.bfloat16),
                              wd[...], preferred_element_type=jnp.float32) + bd[...]
                res_buf[...] = res.reshape(Bb, L, cpad)
            else:
                res_buf[...] = x_cur

            h = jnp.maximum(causal_conv(w1, b1, d), 0.0)
            buf[:, pad_base:pad_base + L, :] = h.reshape(Bb, L, cpad)
            h = jnp.maximum(causal_conv(w2, b2, d), 0.0)
            buf[:, pad_base:pad_base + L, :] = jnp.maximum(
                h.reshape(Bb, L, cpad) + res_buf[...], 0.0)

        o_ref[...] = buf[:, pad_base:pad_base + L, :]   # lane-dense full-width store

    return kernel


def _activation_bytes(bb, L, cin, cpad, pad_base):
    # scratch buf + residual scratch + 2x (pipelined) out block + 2x (pipelined) in block
    return 4 * bb * ((pad_base + L) * cpad + L * cpad + 2 * L * cpad + 2 * L * cin)


def _choose_batch_block(B, L, cin, cpad, pad_base):
    """Pick Bb so the matmul M-dim (Bb*L) targets >=256 rows, the activation footprint
    fits a conservative VMEM cap (v7x-safe), Bb divides B, and grid = B/Bb >= 2."""
    target_rows = 256
    bb = min(B, max(1, -(-target_rows // L)))
    act_cap = 24 * 1024 * 1024
    while bb > 1 and _activation_bytes(bb, L, cin, cpad, pad_base) > act_cap:
        bb -= 1
    while B % bb:                       # keep blocks evenly dividing B
        bb -= 1
    if B >= 2 and B // bb < 2:          # >=2 grid steps => both v7x TCs get work
        bb = max(1, B // 2)
        while B % bb:
            bb -= 1
    return bb


def tcn_forward(x_nlc, packed, has_down, ksize, dilations, cpad):
    """x_nlc: (B, L, cin) f32 (unpadded channels). Returns (B, L, cpad) f32."""
    B, L, cin = x_nlc.shape
    pad_base = _round_up(max((ksize - 1) * max(dilations), 1), 8)   # sublane-aligned pad rows
    Bb = _choose_batch_block(B, L, cin, cpad, pad_base)

    flat_args = []
    weight_bytes = 0
    in_specs = [pl.BlockSpec((Bb, L, cin), lambda b: (b, 0, 0))]
    for lvl_params in packed:
        for arr in lvl_params:
            flat_args.append(arr)
            weight_bytes += arr.size * arr.dtype.itemsize
            # Full-array VMEM residency: single copy, no per-step double buffering.
            in_specs.append(pl.BlockSpec(memory_space=pltpu.MemorySpace.VMEM))

    # VMEM budget from the actual footprint (v7x has only 64 MiB per TC).
    act_bytes = _activation_bytes(Bb, L, cin, cpad, pad_base)
    vmem_limit = int(min(max(act_bytes + weight_bytes + (4 << 20), 8 << 20), 60 << 20))
    # Larger L configs than this budget would need an L-tiled variant carrying a
    # receptive-field halo; not required at these sizes.

    return pl.pallas_call(
        make_tcn_kernel(ksize, dilations, has_down, Bb, L, cin, cpad, pad_base),
        out_shape=jax.ShapeDtypeStruct((B, L, cpad), jnp.float32),
        grid=(B // Bb,),
        in_specs=in_specs,
        out_specs=pl.BlockSpec((Bb, L, cpad), lambda b: (b, 0, 0)),
        scratch_shapes=[pltpu.VMEM((Bb, pad_base + L, cpad), jnp.float32),
                        pltpu.VMEM((Bb, L, cpad), jnp.float32)],
        compiler_params=pltpu.CompilerParams(
            dimension_semantics=("parallel",),
            vmem_limit_bytes=vmem_limit),
    )(x_nlc, *flat_args)


# --------------------------------------------------------------------------------------
# Parameter construction / packing (weight_norm folded into effective weights).
# --------------------------------------------------------------------------------------
def init_params(key, input_size, num_channels, ksize):
    """Deterministic synthetic parameters (shapes as in TemporalConvNet __init__)."""
    params = []
    ch_in = input_size
    for ch_out in num_channels:
        k1, k2, k3, k4, k5, k6, key = jax.random.split(key, 7)
        w1 = 0.1 * jax.random.normal(k1, (ksize, ch_in, ch_out), jnp.float32)
        b1 = 0.1 * jax.random.normal(k2, (1, ch_out), jnp.float32)
        w2 = 0.1 * jax.random.normal(k3, (ksize, ch_out, ch_out), jnp.float32)
        b2 = 0.1 * jax.random.normal(k4, (1, ch_out), jnp.float32)
        if ch_in != ch_out:
            wd = 0.1 * jax.random.normal(k5, (ch_in, ch_out), jnp.float32)
            bd = 0.1 * jax.random.normal(k6, (1, ch_out), jnp.float32)
        else:
            wd, bd = None, None
        params.append((w1, b1, w2, b2, wd, bd))
        ch_in = ch_out
    return params


def pack_params(params, ksize, cpad):
    """Zero-pad channels to cpad; keep per-tap (ksize, cpad, cpad) bf16 weights
    (accumulated-matmul formulation). Biases stay f32."""
    packed, has_down = [], []
    for (w1, b1, w2, b2, wd, bd) in params:
        def pad_w(w):
            wp = jnp.zeros((ksize, cpad, cpad), jnp.float32)
            wp = wp.at[:, :w.shape[1], :w.shape[2]].set(w)
            return wp.astype(jnp.bfloat16)

        def pad_b(b):
            return jnp.zeros((1, cpad), jnp.float32).at[:, :b.shape[1]].set(b)

        lvl = [pad_w(w1), pad_b(b1), pad_w(w2), pad_b(b2)]
        if wd is not None:
            wdp = (jnp.zeros((cpad, cpad), jnp.float32)
                   .at[:wd.shape[0], :wd.shape[1]].set(wd).astype(jnp.bfloat16))
            lvl += [wdp, pad_b(bd)]
            has_down.append(True)
        else:
            has_down.append(False)
        packed.append(tuple(lvl))
    return packed, has_down


def autoencoder_forward(x_ncl, params, ksize):
    """x_ncl: (B, input_size, L) like PyTorch Conv1d input -> (B, num_channels[-1], L)."""
    B, cin0, L = x_ncl.shape
    n_levels = len(params)
    dilations = [2 ** l for l in range(n_levels)]
    max_ch = max([cin0] + [p[0].shape[2] for p in params])
    cpad = _round_up(max_ch, 128)                      # lane-dense working channel width

    packed, has_down = pack_params(params, ksize, cpad)

    x = jnp.transpose(x_ncl, (0, 2, 1)).astype(jnp.float32)   # NCL -> NLC, channels UNPADDED

    y = tcn_forward(x, packed, has_down, ksize, dilations, cpad)

    cout = params[-1][0].shape[2]
    out = jnp.transpose(y[:, :, :cout], (0, 2, 1))            # NLC -> NCL, drop padding
    # TODO(synk): .double() — TPU has no native f64; without jax_enable_x64 this cast stays f32.
    return out.astype(jnp.float64)


if __name__ == "__main__":
    B, input_size, L = 2, 4, 16
    num_channels = [8, 8]     # level 0 needs a 1x1 downsample (4->8); level 1 is identity residual
    kernel_size = 3
    dropout = 0.0             # eval-mode / identity
    wta_k = 1                 # unused by forward (Sparsify1D_kactive never applied)

    key = jax.random.PRNGKey(0)
    kx, kp = jax.random.split(key)
    x = jax.random.normal(kx, (B, input_size, L), jnp.float32)
    params = init_params(kp, input_size, num_channels, kernel_size)

    out = autoencoder_forward(x, params, kernel_size)
    jax.block_until_ready(out)
    assert out.shape == (B, num_channels[-1], L), out.shape
    print("KERNEL_OK")
</pallas_src>

<mosaic_0001>
module attributes {stable_mosaic.version = 11 : i64} {
  func.func @kernel(%arg0: i32, %arg1: memref<1x16x4xf32, #tpu.memory_space<vmem>>, %arg2: memref<3x128x128xbf16, #tpu.memory_space<vmem>>, %arg3: memref<1x128xf32, #tpu.memory_space<vmem>>, %arg4: memref<3x128x128xbf16, #tpu.memory_space<vmem>>, %arg5: memref<1x128xf32, #tpu.memory_space<vmem>>, %arg6: memref<128x128xbf16, #tpu.memory_space<vmem>>, %arg7: memref<1x128xf32, #tpu.memory_space<vmem>>, %arg8: memref<3x128x128xbf16, #tpu.memory_space<vmem>>, %arg9: memref<1x128xf32, #tpu.memory_space<vmem>>, %arg10: memref<3x128x128xbf16, #tpu.memory_space<vmem>>, %arg11: memref<1x128xf32, #tpu.memory_space<vmem>>, %arg12: memref<1x16x128xf32, #tpu.memory_space<vmem>>, %arg13: memref<1x24x128xf32, #tpu.memory_space<vmem>>, %arg14: memref<1x16x128xf32, #tpu.memory_space<vmem>>) attributes {dimension_semantics = [#tpu.dimension_semantics<parallel>], iteration_bounds = array<i64: 2>, scalar_prefetch = 0 : i64, scratch_operands = 2 : i64, tpu.core_type = #tpu.core_type<tc>, window_params = [{transform_indices = @transform_0, window_bounds = array<i64: 1, 16, 4>}, {pipeline_mode = #tpu.pipeline_mode<synchronous>, transform_indices = @transform_1, window_bounds = array<i64: 3, 128, 128>}, {pipeline_mode = #tpu.pipeline_mode<synchronous>, transform_indices = @transform_2, window_bounds = array<i64: 1, 128>}, {pipeline_mode = #tpu.pipeline_mode<synchronous>, transform_indices = @transform_3, window_bounds = array<i64: 3, 128, 128>}, {pipeline_mode = #tpu.pipeline_mode<synchronous>, transform_indices = @transform_4, window_bounds = array<i64: 1, 128>}, {pipeline_mode = #tpu.pipeline_mode<synchronous>, transform_indices = @transform_5, window_bounds = array<i64: 128, 128>}, {pipeline_mode = #tpu.pipeline_mode<synchronous>, transform_indices = @transform_6, window_bounds = array<i64: 1, 128>}, {pipeline_mode = #tpu.pipeline_mode<synchronous>, transform_indices = @transform_7, window_bounds = array<i64: 3, 128, 128>}, {pipeline_mode = #tpu.pipeline_mode<synchronous>, transform_indices = @transform_8, window_bounds = array<i64: 1, 128>}, {pipeline_mode = #tpu.pipeline_mode<synchronous>, transform_indices = @transform_9, window_bounds = array<i64: 3, 128, 128>}, {pipeline_mode = #tpu.pipeline_mode<synchronous>, transform_indices = @transform_10, window_bounds = array<i64: 1, 128>}, {transform_indices = @transform_11, window_bounds = array<i64: 1, 16, 128>}]} {
    %cst = arith.constant 0.000000e+00 : f32
    %0 = vector.broadcast %cst : f32 to vector<1x24x128xf32>
    %c0 = arith.constant 0 : index
    %c0_0 = arith.constant 0 : index
    %c0_1 = arith.constant 0 : index
    %1 = vector.load %arg13[%c0, %c0_0, %c0_1] : memref<1x24x128xf32, #tpu.memory_space<vmem>>, vector<1x24x128xf32>
    tpu.vector_store %arg13[%c0, %c0_0, %c0_1], %0 {strides = array<i32>} : memref<1x24x128xf32, #tpu.memory_space<vmem>>, vector<1x24x128xf32>,
    %c0_2 = arith.constant 0 : index
    %c0_3 = arith.constant 0 : index
    %c0_4 = arith.constant 0 : index
    %2 = vector.load %arg1[%c0_2, %c0_3, %c0_4] : memref<1x16x4xf32, #tpu.memory_space<vmem>>, vector<1x16x4xf32>
    %c0_5 = arith.constant 0 : index
    %c8 = arith.constant 8 : index
    %c0_6 = arith.constant 0 : index
    %3 = vector.load %arg13[%c0_5, %c8, %c0_6] : memref<1x24x128xf32, #tpu.memory_space<vmem>>, vector<1x16x4xf32>
    tpu.vector_store %arg13[%c0_5, %c8, %c0_6], %2 {strides = array<i32>} : memref<1x24x128xf32, #tpu.memory_space<vmem>>, vector<1x16x4xf32>,
    %c0_7 = arith.constant 0 : index
    %c8_8 = arith.constant 8 : index
    %c0_9 = arith.constant 0 : index
    %4 = vector.load %arg13[%c0_7, %c8_8, %c0_9] : memref<1x24x128xf32, #tpu.memory_space<vmem>>, vector<1x16x128xf32>
    %5 = vector.shape_cast %4 : vector<1x16x128xf32> to vector<16x128xf32>
    %6 = arith.truncf %5 : vector<16x128xf32> to vector<16x128xbf16>
    %c0_10 = arith.constant 0 : index
    %c0_11 = arith.constant 0 : index
    %7 = vector.load %arg6[%c0_10, %c0_11] : memref<128x128xbf16, #tpu.memory_space<vmem>>, vector<128x128xbf16>
    %cst_12 = arith.constant dense<0.000000e+00> : vector<16x128xf32>
    %8 = tpu.matmul %6, %7, %cst_12 {dimension_numbers = #tpu.dot_dimension_numbers<[1], [0], [0], [1], [0, 0, 1, 1], [], []>} : vector<16x128xbf16>, vector<128x128xbf16>, vector<16x128xf32> -> vector<16x128xf32>
    %c0_13 = arith.constant 0 : index
    %c0_14 = arith.constant 0 : index
    %9 = vector.load %arg7[%c0_13, %c0_14] : memref<1x128xf32, #tpu.memory_space<vmem>>, vector<1x128xf32>
    %10 = vector.broadcast %9 : vector<1x128xf32> to vector<16x128xf32>
    %11 = arith.addf %8, %10 : vector<16x128xf32>
    %12 = vector.shape_cast %11 : vector<16x128xf32> to vector<1x16x128xf32>
    %c0_15 = arith.constant 0 : index
    %c0_16 = arith.constant 0 : index
    %c0_17 = arith.constant 0 : index
    %13 = vector.load %arg14[%c0_15, %c0_16, %c0_17] : memref<1x16x128xf32, #tpu.memory_space<vmem>>, vector<1x16x128xf32>
    tpu.vector_store %arg14[%c0_15, %c0_16, %c0_17], %12 {strides = array<i32>} : memref<1x16x128xf32, #tpu.memory_space<vmem>>, vector<1x16x128xf32>,
    %c0_18 = arith.constant 0 : index
    %c6 = arith.constant 6 : index
    %c0_19 = arith.constant 0 : index
    %14 = vector.load %arg13[%c0_18, %c6, %c0_19] : memref<1x24x128xf32, #tpu.memory_space<vmem>>, vector<1x16x128xf32>
    %15 = vector.shape_cast %14 : vector<1x16x128xf32> to vector<16x128xf32>
    %16 = arith.truncf %15 : vector<16x128xf32> to vector<16x128xbf16>
    %c0_20 = arith.constant 0 : index
    %c0_21 = arith.constant 0 : index
    %c0_22 = arith.constant 0 : index
    %17 = vector.load %arg2[%c0_20, %c0_21, %c0_22] : memref<3x128x128xbf16, #tpu.memory_space<vmem>>, vector<1x128x128xbf16>
    %18 = vector.shape_cast %17 : vector<1x128x128xbf16> to vector<128x128xbf16>
    %cst_23 = arith.constant dense<0.000000e+00> : vector<16x128xf32>
    %19 = tpu.matmul %16, %18, %cst_23 {dimension_numbers = #tpu.dot_dimension_numbers<[1], [0], [0], [1], [0, 0, 1, 1], [], []>} : vector<16x128xbf16>, vector<128x128xbf16>, vector<16x128xf32> -> vector<16x128xf32>
    %c0_24 = arith.constant 0 : index
    %c7 = arith.constant 7 : index
    %c0_25 = arith.constant 0 : index
    %20 = vector.load %arg13[%c0_24, %c7, %c0_25] : memref<1x24x128xf32, #tpu.memory_space<vmem>>, vector<1x16x128xf32>
    %21 = vector.shape_cast %20 : vector<1x16x128xf32> to vector<16x128xf32>
    %22 = arith.truncf %21 : vector<16x128xf32> to vector<16x128xbf16>
    %c1 = arith.constant 1 : index
    %c0_26 = arith.constant 0 : index
    %c0_27 = arith.constant 0 : index
    %23 = vector.load %arg2[%c1, %c0_26, %c0_27] : memref<3x128x128xbf16, #tpu.memory_space<vmem>>, vector<1x128x128xbf16>
    %24 = vector.shape_cast %23 : vector<1x128x128xbf16> to vector<128x128xbf16>
    %cst_28 = arith.constant dense<0.000000e+00> : vector<16x128xf32>
    %25 = tpu.matmul %22, %24, %cst_28 {dimension_numbers = #tpu.dot_dimension_numbers<[1], [0], [0], [1], [0, 0, 1, 1], [], []>} : vector<16x128xbf16>, vector<128x128xbf16>, vector<16x128xf32> -> vector<16x128xf32>
    %26 = arith.addf %19, %25 : vector<16x128xf32>
    %c0_29 = arith.constant 0 : index
    %c8_30 = arith.constant 8 : index
    %c0_31 = arith.constant 0 : index
    %27 = vector.load %arg13[%c0_29, %c8_30, %c0_31] : memref<1x24x128xf32, #tpu.memory_space<vmem>>, vector<1x16x128xf32>
    %28 = vector.shape_cast %27 : vector<1x16x128xf32> to vector<16x128xf32>
    %29 = arith.truncf %28 : vector<16x128xf32> to vector<16x128xbf16>
    %c2 = arith.constant 2 : index
    %c0_32 = arith.constant 0 : index
    %c0_33 = arith.constant 0 : index
    %30 = vector.load %arg2[%c2, %c0_32, %c0_33] : memref<3x128x128xbf16, #tpu.memory_space<vmem>>, vector<1x128x128xbf16>
    %31 = vector.shape_cast %30 : vector<1x128x128xbf16> to vector<128x128xbf16>
    %cst_34 = arith.constant dense<0.000000e+00> : vector<16x128xf32>
    %32 = tpu.matmul %29, %31, %cst_34 {dimension_numbers = #tpu.dot_dimension_numbers<[1], [0], [0], [1], [0, 0, 1, 1], [], []>} : vector<16x128xbf16>, vector<128x128xbf16>, vector<16x128xf32> -> vector<16x128xf32>
    %33 = arith.addf %26, %32 : vector<16x128xf32>
    %c0_35 = arith.constant 0 : index
    %c0_36 = arith.constant 0 : index
    %34 = vector.load %arg3[%c0_35, %c0_36] : memref<1x128xf32, #tpu.memory_space<vmem>>, vector<1x128xf32>
    %35 = vector.broadcast %34 : vector<1x128xf32> to vector<16x128xf32>
    %36 = arith.addf %33, %35 : vector<16x128xf32>
    %cst_37 = arith.constant 0.000000e+00 : f32
    %37 = vector.broadcast %cst_37 : f32 to vector<16x128xf32>
    %38 = arith.maximumf %36, %37 : vector<16x128xf32>
    %39 = vector.shape_cast %38 : vector<16x128xf32> to vector<1x16x128xf32>
    %c0_38 = arith.constant 0 : index
    %c8_39 = arith.constant 8 : index
    %c0_40 = arith.constant 0 : index
    %40 = vector.load %arg13[%c0_38, %c8_39, %c0_40] : memref<1x24x128xf32, #tpu.memory_space<vmem>>, vector<1x16x128xf32>
    tpu.vector_store %arg13[%c0_38, %c8_39, %c0_40], %39 {strides = array<i32>} : memref<1x24x128xf32, #tpu.memory_space<vmem>>, vector<1x16x128xf32>,
    %c0_41 = arith.constant 0 : index
    %c6_42 = arith.constant 6 : index
    %c0_43 = arith.constant 0 : index
    %41 = vector.load %arg13[%c0_41, %c6_42, %c0_43] : memref<1x24x128xf32, #tpu.memory_space<vmem>>, vector<1x16x128xf32>
    %42 = vector.shape_cast %41 : vector<1x16x128xf32> to vector<16x128xf32>
    %43 = arith.truncf %42 : vector<16x128xf32> to vector<16x128xbf16>
    %c0_44 = arith.constant 0 : index
    %c0_45 = arith.constant 0 : index
    %c0_46 = arith.constant 0 : index
    %44 = vector.load %arg4[%c0_44, %c0_45, %c0_46] : memref<3x128x128xbf16, #tpu.memory_space<vmem>>, vector<1x128x128xbf16>
    %45 = vector.shape_cast %44 : vector<1x128x128xbf16> to vector<128x128xbf16>
    %cst_47 = arith.constant dense<0.000000e+00> : vector<16x128xf32>
    %46 = tpu.matmul %43, %45, %cst_47 {dimension_numbers = #tpu.dot_dimension_numbers<[1], [0], [0], [1], [0, 0, 1, 1], [], []>} : vector<16x128xbf16>, vector<128x128xbf16>, vector<16x128xf32> -> vector<16x128xf32>
    %c0_48 = arith.constant 0 : index
    %c7_49 = arith.constant 7 : index
    %c0_50 = arith.constant 0 : index
    %47 = vector.load %arg13[%c0_48, %c7_49, %c0_50] : memref<1x24x128xf32, #tpu.memory_space<vmem>>, vector<1x16x128xf32>
    %48 = vector.shape_cast %47 : vector<1x16x128xf32> to vector<16x128xf32>
    %49 = arith.truncf %48 : vector<16x128xf32> to vector<16x128xbf16>
    %c1_51 = arith.constant 1 : index
    %c0_52 = arith.constant 0 : index
    %c0_53 = arith.constant 0 : index
    %50 = vector.load %arg4[%c1_51, %c0_52, %c0_53] : memref<3x128x128xbf16, #tpu.memory_space<vmem>>, vector<1x128x128xbf16>
    %51 = vector.shape_cast %50 : vector<1x128x128xbf16> to vector<128x128xbf16>
    %cst_54 = arith.constant dense<0.000000e+00> : vector<16x128xf32>
    %52 = tpu.matmul %49, %51, %cst_54 {dimension_numbers = #tpu.dot_dimension_numbers<[1], [0], [0], [1], [0, 0, 1, 1], [], []>} : vector<16x128xbf16>, vector<128x128xbf16>, vector<16x128xf32> -> vector<16x128xf32>
    %53 = arith.addf %46, %52 : vector<16x128xf32>
    %c0_55 = arith.constant 0 : index
    %c8_56 = arith.constant 8 : index
    %c0_57 = arith.constant 0 : index
    %54 = vector.load %arg13[%c0_55, %c8_56, %c0_57] : memref<1x24x128xf32, #tpu.memory_space<vmem>>, vector<1x16x128xf32>
    %55 = vector.shape_cast %54 : vector<1x16x128xf32> to vector<16x128xf32>
    %56 = arith.truncf %55 : vector<16x128xf32> to vector<16x128xbf16>
    %c2_58 = arith.constant 2 : index
    %c0_59 = arith.constant 0 : index
    %c0_60 = arith.constant 0 : index
    %57 = vector.load %arg4[%c2_58, %c0_59, %c0_60] : memref<3x128x128xbf16, #tpu.memory_space<vmem>>, vector<1x128x128xbf16>
    %58 = vector.shape_cast %57 : vector<1x128x128xbf16> to vector<128x128xbf16>
    %cst_61 = arith.constant dense<0.000000e+00> : vector<16x128xf32>
    %59 = tpu.matmul %56, %58, %cst_61 {dimension_numbers = #tpu.dot_dimension_numbers<[1], [0], [0], [1], [0, 0, 1, 1], [], []>} : vector<16x128xbf16>, vector<128x128xbf16>, vector<16x128xf32> -> vector<16x128xf32>
    %60 = arith.addf %53, %59 : vector<16x128xf32>
    %c0_62 = arith.constant 0 : index
    %c0_63 = arith.constant 0 : index
    %61 = vector.load %arg5[%c0_62, %c0_63] : memref<1x128xf32, #tpu.memory_space<vmem>>, vector<1x128xf32>
    %62 = vector.broadcast %61 : vector<1x128xf32> to vector<16x128xf32>
    %63 = arith.addf %60, %62 : vector<16x128xf32>
    %cst_64 = arith.constant 0.000000e+00 : f32
    %64 = vector.broadcast %cst_64 : f32 to vector<16x128xf32>
    %65 = arith.maximumf %63, %64 : vector<16x128xf32>
    %66 = vector.shape_cast %65 : vector<16x128xf32> to vector<1x16x128xf32>
    %c0_65 = arith.constant 0 : index
    %c0_66 = arith.constant 0 : index
    %c0_67 = arith.constant 0 : index
    %67 = vector.load %arg14[%c0_65, %c0_66, %c0_67] : memref<1x16x128xf32, #tpu.memory_space<vmem>>, vector<1x16x128xf32>
    %68 = arith.addf %66, %67 : vector<1x16x128xf32>
    %cst_68 = arith.constant 0.000000e+00 : f32
    %69 = vector.broadcast %cst_68 : f32 to vector<1x16x128xf32>
    %70 = arith.maximumf %68, %69 : vector<1x16x128xf32>
    %c0_69 = arith.constant 0 : index
    %c8_70 = arith.constant 8 : index
    %c0_71 = arith.constant 0 : index
    %71 = vector.load %arg13[%c0_69, %c8_70, %c0_71] : memref<1x24x128xf32, #tpu.memory_space<vmem>>, vector<1x16x128xf32>
    tpu.vector_store %arg13[%c0_69, %c8_70, %c0_71], %70 {strides = array<i32>} : memref<1x24x128xf32, #tpu.memory_space<vmem>>, vector<1x16x128xf32>,
    %c0_72 = arith.constant 0 : index
    %c8_73 = arith.constant 8 : index
    %c0_74 = arith.constant 0 : index
    %72 = vector.load %arg13[%c0_72, %c8_73, %c0_74] : memref<1x24x128xf32, #tpu.memory_space<vmem>>, vector<1x16x128xf32>
    %c0_75 = arith.constant 0 : index
    %c0_76 = arith.constant 0 : index
    %c0_77 = arith.constant 0 : index
    %73 = vector.load %arg14[%c0_75, %c0_76, %c0_77] : memref<1x16x128xf32, #tpu.memory_space<vmem>>, vector<1x16x128xf32>
    tpu.vector_store %arg14[%c0_75, %c0_76, %c0_77], %72 {strides = array<i32>} : memref<1x16x128xf32, #tpu.memory_space<vmem>>, vector<1x16x128xf32>,
    %c0_78 = arith.constant 0 : index
    %c4 = arith.constant 4 : index
    %c0_79 = arith.constant 0 : index
    %74 = vector.load %arg13[%c0_78, %c4, %c0_79] : memref<1x24x128xf32, #tpu.memory_space<vmem>>, vector<1x16x128xf32>
    %75 = vector.shape_cast %74 : vector<1x16x128xf32> to vector<16x128xf32>
    %76 = arith.truncf %75 : vector<16x128xf32> to vector<16x128xbf16>
    %c0_80 = arith.constant 0 : index
    %c0_81 = arith.constant 0 : index
    %c0_82 = arith.constant 0 : index
    %77 = vector.load %arg8[%c0_80, %c0_81, %c0_82] : memref<3x128x128xbf16, #tpu.memory_space<vmem>>, vector<1x128x128xbf16>
    %78 = vector.shape_cast %77 : vector<1x128x128xbf16> to vector<128x128xbf16>
    %cst_83 = arith.constant dense<0.000000e+00> : vector<16x128xf32>
    %79 = tpu.matmul %76, %78, %cst_83 {dimension_numbers = #tpu.dot_dimension_numbers<[1], [0], [0], [1], [0, 0, 1, 1], [], []>} : vector<16x128xbf16>, vector<128x128xbf16>, vector<16x128xf32> -> vector<16x128xf32>
    %c0_84 = arith.constant 0 : index
    %c6_85 = arith.constant 6 : index
    %c0_86 = arith.constant 0 : index
    %80 = vector.load %arg13[%c0_84, %c6_85, %c0_86] : memref<1x24x128xf32, #tpu.memory_space<vmem>>, vector<1x16x128xf32>
    %81 = vector.shape_cast %80 : vector<1x16x128xf32> to vector<16x128xf32>
    %82 = arith.truncf %81 : vector<16x128xf32> to vector<16x128xbf16>
    %c1_87 = arith.constant 1 : index
    %c0_88 = arith.constant 0 : index
    %c0_89 = arith.constant 0 : index
    %83 = vector.load %arg8[%c1_87, %c0_88, %c0_89] : memref<3x128x128xbf16, #tpu.memory_space<vmem>>, vector<1x128x128xbf16>
    %84 = vector.shape_cast %83 : vector<1x128x128xbf16> to vector<128x128xbf16>
    %cst_90 = arith.constant dense<0.000000e+00> : vector<16x128xf32>
    %85 = tpu.matmul %82, %84, %cst_90 {dimension_numbers = #tpu.dot_dimension_numbers<[1], [0], [0], [1], [0, 0, 1, 1], [], []>} : vector<16x128xbf16>, vector<128x128xbf16>, vector<16x128xf32> -> vector<16x128xf32>
    %86 = arith.addf %79, %85 : vector<16x128xf32>
    %c0_91 = arith.constant 0 : index
    %c8_92 = arith.constant 8 : index
    %c0_93 = arith.constant 0 : index
    %87 = vector.load %arg13[%c0_91, %c8_92, %c0_93] : memref<1x24x128xf32, #tpu.memory_space<vmem>>, vector<1x16x128xf32>
    %88 = vector.shape_cast %87 : vector<1x16x128xf32> to vector<16x128xf32>
    %89 = arith.truncf %88 : vector<16x128xf32> to vector<16x128xbf16>
    %c2_94 = arith.constant 2 : index
    %c0_95 = arith.constant 0 : index
    %c0_96 = arith.constant 0 : index
    %90 = vector.load %arg8[%c2_94, %c0_95, %c0_96] : memref<3x128x128xbf16, #tpu.memory_space<vmem>>, vector<1x128x128xbf16>
    %91 = vector.shape_cast %90 : vector<1x128x128xbf16> to vector<128x128xbf16>
    %cst_97 = arith.constant dense<0.000000e+00> : vector<16x128xf32>
    %92 = tpu.matmul %89, %91, %cst_97 {dimension_numbers = #tpu.dot_dimension_numbers<[1], [0], [0], [1], [0, 0, 1, 1], [], []>} : vector<16x128xbf16>, vector<128x128xbf16>, vector<16x128xf32> -> vector<16x128xf32>
    %93 = arith.addf %86, %92 : vector<16x128xf32>
    %c0_98 = arith.constant 0 : index
    %c0_99 = arith.constant 0 : index
    %94 = vector.load %arg9[%c0_98, %c0_99] : memref<1x128xf32, #tpu.memory_space<vmem>>, vector<1x128xf32>
    %95 = vector.broadcast %94 : vector<1x128xf32> to vector<16x128xf32>
    %96 = arith.addf %93, %95 : vector<16x128xf32>
    %cst_100 = arith.constant 0.000000e+00 : f32
    %97 = vector.broadcast %cst_100 : f32 to vector<16x128xf32>
    %98 = arith.maximumf %96, %97 : vector<16x128xf32>
    %99 = vector.shape_cast %98 : vector<16x128xf32> to vector<1x16x128xf32>
    %c0_101 = arith.constant 0 : index
    %c8_102 = arith.constant 8 : index
    %c0_103 = arith.constant 0 : index
    %100 = vector.load %arg13[%c0_101, %c8_102, %c0_103] : memref<1x24x128xf32, #tpu.memory_space<vmem>>, vector<1x16x128xf32>
    tpu.vector_store %arg13[%c0_101, %c8_102, %c0_103], %99 {strides = array<i32>} : memref<1x24x128xf32, #tpu.memory_space<vmem>>, vector<1x16x128xf32>,
    %c0_104 = arith.constant 0 : index
    %c4_105 = arith.constant 4 : index
    %c0_106 = arith.constant 0 : index
    %101 = vector.load %arg13[%c0_104, %c4_105, %c0_106] : memref<1x24x128xf32, #tpu.memory_space<vmem>>, vector<1x16x128xf32>
    %102 = vector.shape_cast %101 : vector<1x16x128xf32> to vector<16x128xf32>
    %103 = arith.truncf %102 : vector<16x128xf32> to vector<16x128xbf16>
    %c0_107 = arith.constant 0 : index
    %c0_108 = arith.constant 0 : index
    %c0_109 = arith.constant 0 : index
    %104 = vector.load %arg10[%c0_107, %c0_108, %c0_109] : memref<3x128x128xbf16, #tpu.memory_space<vmem>>, vector<1x128x128xbf16>
    %105 = vector.shape_cast %104 : vector<1x128x128xbf16> to vector<128x128xbf16>
    %cst_110 = arith.constant dense<0.000000e+00> : vector<16x128xf32>
    %106 = tpu.matmul %103, %105, %cst_110 {dimension_numbers = #tpu.dot_dimension_numbers<[1], [0], [0], [1], [0, 0, 1, 1], [], []>} : vector<16x128xbf16>, vector<128x128xbf16>, vector<16x128xf32> -> vector<16x128xf32>
    %c0_111 = arith.constant 0 : index
    %c6_112 = arith.constant 6 : index
    %c0_113 = arith.constant 0 : index
    %107 = vector.load %arg13[%c0_111, %c6_112, %c0_113] : memref<1x24x128xf32, #tpu.memory_space<vmem>>, vector<1x16x128xf32>
    %108 = vector.shape_cast %107 : vector<1x16x128xf32> to vector<16x128xf32>
    %109 = arith.truncf %108 : vector<16x128xf32> to vector<16x128xbf16>
    %c1_114 = arith.constant 1 : index
    %c0_115 = arith.constant 0 : index
    %c0_116 = arith.constant 0 : index
    %110 = vector.load %arg10[%c1_114, %c0_115, %c0_116] : memref<3x128x128xbf16, #tpu.memory_space<vmem>>, vector<1x128x128xbf16>
    %111 = vector.shape_cast %110 : vector<1x128x128xbf16> to vector<128x128xbf16>
    %cst_117 = arith.constant dense<0.000000e+00> : vector<16x128xf32>
    %112 = tpu.matmul %109, %111, %cst_117 {dimension_numbers = #tpu.dot_dimension_numbers<[1], [0], [0], [1], [0, 0, 1, 1], [], []>} : vector<16x128xbf16>, vector<128x128xbf16>, vector<16x128xf32> -> vector<16x128xf32>
    %113 = arith.addf %106, %112 : vector<16x128xf32>
    %c0_118 = arith.constant 0 : index
    %c8_119 = arith.constant 8 : index
    %c0_120 = arith.constant 0 : index
    %114 = vector.load %arg13[%c0_118, %c8_119, %c0_120] : memref<1x24x128xf32, #tpu.memory_space<vmem>>, vector<1x16x128xf32>
    %115 = vector.shape_cast %114 : vector<1x16x128xf32> to vector<16x128xf32>
    %116 = arith.truncf %115 : vector<16x128xf32> to vector<16x128xbf16>
    %c2_121 = arith.constant 2 : index
    %c0_122 = arith.constant 0 : index
    %c0_123 = arith.constant 0 : index
    %117 = vector.load %arg10[%c2_121, %c0_122, %c0_123] : memref<3x128x128xbf16, #tpu.memory_space<vmem>>, vector<1x128x128xbf16>
    %118 = vector.shape_cast %117 : vector<1x128x128xbf16> to vector<128x128xbf16>
    %cst_124 = arith.constant dense<0.000000e+00> : vector<16x128xf32>
    %119 = tpu.matmul %116, %118, %cst_124 {dimension_numbers = #tpu.dot_dimension_numbers<[1], [0], [0], [1], [0, 0, 1, 1], [], []>} : vector<16x128xbf16>, vector<128x128xbf16>, vector<16x128xf32> -> vector<16x128xf32>
    %120 = arith.addf %113, %119 : vector<16x128xf32>
    %c0_125 = arith.constant 0 : index
    %c0_126 = arith.constant 0 : index
    %121 = vector.load %arg11[%c0_125, %c0_126] : memref<1x128xf32, #tpu.memory_space<vmem>>, vector<1x128xf32>
    %122 = vector.broadcast %121 : vector<1x128xf32> to vector<16x128xf32>
    %123 = arith.addf %120, %122 : vector<16x128xf32>
    %cst_127 = arith.constant 0.000000e+00 : f32
    %124 = vector.broadcast %cst_127 : f32 to vector<16x128xf32>
    %125 = arith.maximumf %123, %124 : vector<16x128xf32>
    %126 = vector.shape_cast %125 : vector<16x128xf32> to vector<1x16x128xf32>
    %c0_128 = arith.constant 0 : index
    %c0_129 = arith.constant 0 : index
    %c0_130 = arith.constant 0 : index
    %127 = vector.load %arg14[%c0_128, %c0_129, %c0_130] : memref<1x16x128xf32, #tpu.memory_space<vmem>>, vector<1x16x128xf32>
    %128 = arith.addf %126, %127 : vector<1x16x128xf32>
    %cst_131 = arith.constant 0.000000e+00 : f32
    %129 = vector.broadcast %cst_131 : f32 to vector<1x16x128xf32>
    %130 = arith.maximumf %128, %129 : vector<1x16x128xf32>
    %c0_132 = arith.constant 0 : index
    %c8_133 = arith.constant 8 : index
    %c0_134 = arith.constant 0 : index
    %131 = vector.load %arg13[%c0_132, %c8_133, %c0_134] : memref<1x24x128xf32, #tpu.memory_space<vmem>>, vector<1x16x128xf32>
    tpu.vector_store %arg13[%c0_132, %c8_133, %c0_134], %130 {strides = array<i32>} : memref<1x24x128xf32, #tpu.memory_space<vmem>>, vector<1x16x128xf32>,
    %c0_135 = arith.constant 0 : index
    %c8_136 = arith.constant 8 : index
    %c0_137 = arith.constant 0 : index
    %132 = vector.load %arg13[%c0_135, %c8_136, %c0_137] : memref<1x24x128xf32, #tpu.memory_space<vmem>>, vector<1x16x128xf32>
    %c0_138 = arith.constant 0 : index
    %c0_139 = arith.constant 0 : index
    %c0_140 = arith.constant 0 : index
    %133 = vector.load %arg12[%c0_138, %c0_139, %c0_140] : memref<1x16x128xf32, #tpu.memory_space<vmem>>, vector<1x16x128xf32>
    tpu.vector_store %arg12[%c0_138, %c0_139, %c0_140], %132 {strides = array<i32>} : memref<1x16x128xf32, #tpu.memory_space<vmem>>, vector<1x16x128xf32>,
    return
  }
  func.func @transform_0(%arg0: i32) -> (i32, i32, i32) {
    %c0_i32 = arith.constant 0 : i32
    %c0_i32_0 = arith.constant 0 : i32
    %c0_i32_1 = arith.constant 0 : i32
    return %arg0, %c0_i32, %c0_i32_0 : i32, i32, i32
  }
  func.func @transform_1(%arg0: i32) -> (i32, i32, i32) {
    %c0_i32 = arith.constant 0 : i32
    %c0_i32_0 = arith.constant 0 : i32
    %c0_i32_1 = arith.constant 0 : i32
    %c0_i32_2 = arith.constant 0 : i32
    return %c0_i32, %c0_i32_0, %c0_i32_1 : i32, i32, i32
  }
  func.func @transform_2(%arg0: i32) -> (i32, i32) {
    %c0_i32 = arith.constant 0 : i32
    %c0_i32_0 = arith.constant 0 : i32
    %c0_i32_1 = arith.constant 0 : i32
    return %c0_i32, %c0_i32_0 : i32, i32
  }
  func.func @transform_3(%arg0: i32) -> (i32, i32, i32) {
    %c0_i32 = arith.constant 0 : i32
    %c0_i32_0 = arith.constant 0 : i32
    %c0_i32_1 = arith.constant 0 : i32
    %c0_i32_2 = arith.constant 0 : i32
    return %c0_i32, %c0_i32_0, %c0_i32_1 : i32, i32, i32
  }
  func.func @transform_4(%arg0: i32) -> (i32, i32) {
    %c0_i32 = arith.constant 0 : i32
    %c0_i32_0 = arith.constant 0 : i32
    %c0_i32_1 = arith.constant 0 : i32
    return %c0_i32, %c0_i32_0 : i32, i32
  }
  func.func @transform_5(%arg0: i32) -> (i32, i32) {
    %c0_i32 = arith.constant 0 : i32
    %c0_i32_0 = arith.constant 0 : i32
    %c0_i32_1 = arith.constant 0 : i32
    return %c0_i32, %c0_i32_0 : i32, i32
  }
  func.func @transform_6(%arg0: i32) -> (i32, i32) {
    %c0_i32 = arith.constant 0 : i32
    %c0_i32_0 = arith.constant 0 : i32
    %c0_i32_1 = arith.constant 0 : i32
    return %c0_i32, %c0_i32_0 : i32, i32
  }
  func.func @transform_7(%arg0: i32) -> (i32, i32, i32) {
    %c0_i32 = arith.constant 0 : i32
    %c0_i32_0 = arith.constant 0 : i32
    %c0_i32_1 = arith.constant 0 : i32
    %c0_i32_2 = arith.constant 0 : i32
    return %c0_i32, %c0_i32_0, %c0_i32_1 : i32, i32, i32
  }
  func.func @transform_8(%arg0: i32) -> (i32, i32) {
    %c0_i32 = arith.constant 0 : i32
    %c0_i32_0 = arith.constant 0 : i32
    %c0_i32_1 = arith.constant 0 : i32
    return %c0_i32, %c0_i32_0 : i32, i32
  }
  func.func @transform_9(%arg0: i32) -> (i32, i32, i32) {
    %c0_i32 = arith.constant 0 : i32
    %c0_i32_0 = arith.constant 0 : i32
    %c0_i32_1 = arith.constant 0 : i32
    %c0_i32_2 = arith.constant 0 : i32
    return %c0_i32, %c0_i32_0, %c0_i32_1 : i32, i32, i32
  }
  func.func @transform_10(%arg0: i32) -> (i32, i32) {
    %c0_i32 = arith.constant 0 : i32
    %c0_i32_0 = arith.constant 0 : i32
    %c0_i32_1 = arith.constant 0 : i32
    return %c0_i32, %c0_i32_0 : i32, i32
  }
  func.func @transform_11(%arg0: i32) -> (i32, i32, i32) {
    %c0_i32 = arith.constant 0 : i32
    %c0_i32_0 = arith.constant 0 : i32
    %c0_i32_1 = arith.constant 0 : i32
    return %arg0, %c0_i32, %c0_i32_0 : i32, i32, i32
  }
}

</mosaic_0001>

<bundles_post_ra>
// kernel: tpu_custom_call.1
= control target key start
LH: loop header
LB: loop body
LE: loop exit
PB: predicated region body
PF: predicated region fallthrough
CT: control target
= control target key end

     0   :  { %s3517_s0 = inlined_call_operand.vmem [shape: f32[2,16,4], index: 0, kind: input, shape index: {}]   ;;  %s3518_s1 = inlined_call_operand.hbm [shape: bf16[3,128,128], index: 1, kind: input, shape index: {}]   ;;  %s3519_s2 = inlined_call_operand.vmem [shape: f32[1,128], index: 2, kind: input, shape index: {}]   ;;  %s3520_s3 = inlined_call_operand.hbm [shape: bf16[3,128,128], index: 3, kind: input, shape index: {}]   ;;  %s3521_s4 = inlined_call_operand.vmem [shape: f32[1,128], index: 4, kind: input, shape index: {}]   ;;  %s3522_s5 = inlined_call_operand.hbm [shape: bf16[128,128], index: 5, kind: input, shape index: {}]   ;;  %s3523_s6 = inlined_call_operand.vmem [shape: f32[1,128], index: 6, kind: input, shape index: {}]   ;;  %s3524_s7 = inlined_call_operand.hbm [shape: bf16[3,128,128], index: 7, kind: input, shape index: {}]   ;;  %s3525_s8 = inlined_call_operand.vmem [shape: f32[1,128], index: 8, kind: input, shape index: {}]   ;;  %s3526_s9 = inlined_call_operand.hbm [shape: bf16[3,128,128], index: 9, kind: input, shape index: {}]   ;;  %s3527_s10 = inlined_call_operand.vmem [shape: f32[1,128], index: 10, kind: input, shape index: {}]   ;;  %s3528_s11 = inlined_call_operand.hbm [shape: f32[2,16,128], index: 11, kind: output, shape index: {}]  }
   0x1   :  { %3539 = sst [smem:[#allocation24_spill]] %s3520_s3 }
   0x2   :  { %3540 = sst [smem:[#allocation25_spill]] %s3528_s11 }
   0x3   :  { %16 = vsyncpa [#allocation5], 0 }
   0x4   :  { %17 = vsyncpa [#allocation8], 0 }
   0x5   :  { %18 = vsyncpa [#allocation11], 0 }
   0x6   :  { %19 = vsyncpa [#allocation6], 0 }
   0x7   :  { %21 = vsyncpa [#allocation6 + $0x1], 0  ;;  %s3093_s17 = smov 0   ;;  %s3095_s18 = smov 0  }
   0x8   :  { %s3097_s19 = smov 0   ;;  %s3099_s20 = smov 0  }
   0x9 LB: > { %3541 = sst [smem:[#allocation18_spill]] %s3007_s17  ;;  %s3114_s21 = sadd.s32 4294967295, %s3019_s20   ;;  %s3019_s20 = sphi %s3099_s20, %s3566_s20   ;;  %s3015_s19 = sphi %s3097_s19, %s3568_s19   ;;  %s3011_s18 = sphi %s3095_s18, %s3570_s18   ;;  %s3007_s17 = sphi %s3093_s17, %s3569_s17  }
   0xa   : > { %3542 = sst [smem:[#allocation19_spill]] %s3015_s19  ;;  %s2094_s22 = sadd.s32 4294967294, %s3019_s20  }
   0xb   : > { %3543 = sst [smem:[#allocation20_spill]] %s3019_s20  ;;  %s3118_s23 = sadd.s32 1, %s3019_s20  }
   0xc   : > { %3544 = sst [smem:[#allocation21_spill]] %s3118_s23  ;;  %s270_s24 = sadd.s32 1, %s3015_s19 }
   0xd   : > { %s267_s25 = ssub.s32 %s3019_s20, %s3118_s23  ;;  %p280_p0 = scmp.ne.s32.totalorder %s3015_s19, %s3011_s18 }
   0xe   : > { %p268_p1 = scmp.eq.s32.totalorder %s267_s25, 0  ;;  %p281_p2 = scmp.eq.s32.totalorder %s3114_s21, 1 }
   0xf   : > { %p286_p3 = scmp.ne.s32.totalorder %s3011_s18, %s3007_s17  ;;  %p287_p4 = scmp.eq.s32.totalorder %s2094_s22, 1 }
  0x10   : > { %s3129_s26 = scalar_select %p268_p1, %s3015_s19, %s270_s24  }
  0x11   : > { %p3131_p5 = por %p281_p2, %p280_p0  ;;  %p3135_p6 = por %p287_p4, %p286_p3 }
  0x12   : > { %3545 = sst [smem:[#allocation22_spill]] %s3129_s26  ;;  %p2095_p7 = scmp.ge.s32.totalorder %s3019_s20, 1 }
  0x13   : > { %s3546_s27 = scalar_select %p3131_p5, 1, 0 }
  0x14   : > { %s3547_s28 = scalar_select %p3135_p6, 1, 0 }
  0x15   : > { %p294_p8 = scmp.lt.s32.totalorder %s3019_s20, 3  ;;  %p3532_p9 = scmp.eq.s32.totalorder %s3114_s21, 0 }
  0x16   : > { %3548 = sst [smem:[#allocation23_spill]] %s3547_s28  ;;  %s3021_s30 = smov [#allocation7]  }
  0x17   : > { %p3142_p10 = pnand %p2095_p7, %p294_p8  ;;  %s322_s12 = sshll.u32 %s3021_s30, 4  ;;  %s3148_s12 = int_to_ptr.vmem [resolvable:$true] %s322_s12 }
  0x18   : > { %s3022_s14 = smov [#allocation10]   ;;  %s3023_s16 = smov [#allocation4]  }
  0x19   : > { %s3549_s29 = scalar_select %p3142_p10, 1, 0 }
  0x1a   : > { %p2626_p11 = pneg %p3142_p10  ;;  %s354_s15 = sshll.u32 %s3022_s14, 4  ;;  %s3156_s15 = int_to_ptr.vmem [resolvable:$true] %s354_s15 }
  0x1b   : > { %s3158_s22 = sshll.u32 %s3023_s16, 4  ;;  %s3551_s3 = sld [smem:[#allocation24_spill]]  ;;  %s307_s22 = int_to_ptr.vmem [resolvable:$true] %s3158_s22 }
  0x1c   : > { %p3152_p12 = pnand %p3532_p9, %p2626_p11 }
  0x1e   : > { %p3168_p0 = pneg %p3152_p12 }
  0x21   : > { %s2805_s26 = scalar_lea.hbm %s3551_s3, 3072 }
  0x22   : > { %p2806_p13 = scmp.ne.s32.totalorder %s3551_s3, %s2805_s26  ;;  %p2812_p3 = scmp.lt.u32.totalorder %s2805_s26, %s3551_s3 }
  0x24   : > { %p2808_p1 = pnand %p3168_p0, %p2806_p13 }
  0x26   : > { %p2809_p2 = pneg %p2808_p1 }
  0x28   : > { %p2814_p4 = pnand %p2812_p3, %p2809_p2 }
  0x2a   : > { %2817 = shalt.err (!%p2814_p4)
}
  0x2b   : > { %s2818_s19 = scalar_lea.vmem %s3148_s12, 3072  ;;  %p2826_p9 = scmp.lt.s32.totalorder %s3148_s12, %s3148_s12 }
  0x2c   : > { %p2819_p7 = scmp.ne.s32.totalorder %s3148_s12, %s2818_s19  ;;  %p2827_p6 = scmp.lt.s32.totalorder %s2818_s19, %s2818_s19 }
  0x2e   : > { %p2821_p8 = pnand %p2819_p7, %p3168_p0  ;;  %p2828_p13 = por %p2827_p6, %p2826_p9 }
  0x30   : > { %p2822_p11 = pneg %p2821_p8 }
  0x32   : > { %p2829_p1 = pnand %p2828_p13, %p2822_p11 }
  0x34   : > { %2832 = shalt.err (!%p2829_p1)
}
  0x35   : > { %s3024_s24 = smov 64   ;;  %s3025_s26 = smov 4  }
  0x36   : > { %2632 = dma.hbm_to_vmem [thread:$0]  (!%p3152_p12), %s3551_s3, 3072, %s3148_s12, [#allocation8], %s3024_s24, %s3024_s24, %s3025_s26  }
  0x37   : > { %s2833_s19 = scalar_lea.hbm %s3524_s7, 3072 }
  0x38   : > { %p2834_p6 = scmp.ne.s32.totalorder %s3524_s7, %s2833_s19  ;;  %p2840_p3 = scmp.lt.u32.totalorder %s2833_s19, %s3524_s7 }
  0x3a   : > { %p2836_p9 = pnand %p2834_p6, %p3168_p0 }
  0x3c   : > { %p2837_p2 = pneg %p2836_p9 }
  0x3e   : > { %p2842_p4 = pnand %p2840_p3, %p2837_p2 }
  0x40   : > { %2845 = shalt.err (!%p2842_p4)
}
  0x41   : > { %s2846_s12 = scalar_lea.vmem %s3156_s15, 3072  ;;  %p2854_p13 = scmp.lt.s32.totalorder %s3156_s15, %s3156_s15 }
  0x42   : > { %p2847_p7 = scmp.ne.s32.totalorder %s3156_s15, %s2846_s12  ;;  %p2855_p1 = scmp.lt.s32.totalorder %s2846_s12, %s2846_s12 }
  0x44   : > { %p2849_p8 = pnand %p2847_p7, %p3168_p0  ;;  %p2856_p6 = por %p2855_p1, %p2854_p13 }
  0x46   : > { %p2850_p11 = pneg %p2849_p8 }
  0x48   : > { %p2857_p9 = pnand %p2856_p6, %p2850_p11 }
  0x4a   : > { %2860 = shalt.err (!%p2857_p9)
}
  0x4b   : > { %2638 = dma.hbm_to_vmem [thread:$0]  (!%p3152_p12), %s3524_s7, 3072, %s3156_s15, [#allocation11], %s3024_s24, %s3024_s24, %s3025_s26  }
  0x4c   : > { %s2861_s25 = scalar_lea.hbm %s3518_s1, 3072 }
  0x4d   : > { %p2862_p2 = scmp.ne.s32.totalorder %s3518_s1, %s2861_s25  ;;  %p2868_p7 = scmp.lt.u32.totalorder %s2861_s25, %s3518_s1 }
  0x4f   : > { %p2864_p3 = pnand %p2862_p2, %p3168_p0 }
  0x51   : > { %p2865_p4 = pneg %p2864_p3 }
  0x53   : > { %p2870_p8 = pnand %p2868_p7, %p2865_p4 }
  0x55   : > { %2873 = shalt.err (!%p2870_p8)
}
  0x56   : > { %s2874_s12 = scalar_lea.vmem %s307_s22, 3072  ;;  %p2882_p6 = scmp.lt.s32.totalorder %s307_s22, %s307_s22 }
  0x57   : > { %p2875_p11 = scmp.ne.s32.totalorder %s307_s22, %s2874_s12  ;;  %p2883_p9 = scmp.lt.s32.totalorder %s2874_s12, %s2874_s12 }
  0x59   : > { %p2877_p13 = pnand %p2875_p11, %p3168_p0  ;;  %p2884_p5 = por %p2883_p9, %p2882_p6 }
  0x5b   : > { %p2878_p1 = pneg %p2877_p13 }
  0x5d   : > { %p2885_p10 = pnand %p2884_p5, %p2878_p1 }
  0x5f   : > { %2888 = shalt.err (!%p2885_p10)
}
  0x60   : > { %2629 = dma.hbm_to_vmem [thread:$0]  (!%p3152_p12), %s3518_s1, 3072, %s307_s22, [#allocation5], %s3024_s24, %s3024_s24, %s3025_s26  }
  0x61   : > { %s3026_s17 = smov [#allocation9]   ;;  %s3027_s28 = smov [#allocation12]  }
  0x62   : > { %s338_s20 = sshll.u32 %s3026_s17, 4  ;;  %s370_s25 = sshll.u32 %s3027_s28, 4  ;;  %s339_s20 = int_to_ptr.vmem [resolvable:$true] %s338_s20  ;;  %s371_s25 = int_to_ptr.vmem [resolvable:$true] %s370_s25 }
  0x63   : > { %s2889_s16 = scalar_lea.hbm %s3522_s5, 1024 }
  0x64   : > { %p2890_p5 = scmp.ne.s32.totalorder %s3522_s5, %s2889_s16  ;;  %p2896_p3 = scmp.lt.u32.totalorder %s2889_s16, %s3522_s5 }
  0x66   : > { %p2892_p10 = pnand %p2890_p5, %p3168_p0 }
  0x68   : > { %p2893_p2 = pneg %p2892_p10 }
  0x6a   : > { %p2898_p4 = pnand %p2896_p3, %p2893_p2 }
  0x6c   : > { %2901 = shalt.err (!%p2898_p4)
}
  0x6d   : > { %s2902_s22 = scalar_lea.vmem %s339_s20, 1024  ;;  %p2910_p13 = scmp.lt.s32.totalorder %s339_s20, %s339_s20 }
  0x6e   : > { %p2903_p7 = scmp.ne.s32.totalorder %s339_s20, %s2902_s22  ;;  %p2911_p1 = scmp.lt.s32.totalorder %s2902_s22, %s2902_s22 }
  0x70   : > { %p2905_p8 = pnand %p2903_p7, %p3168_p0  ;;  %p2912_p6 = por %p2911_p1, %p2910_p13 }
  0x72   : > { %p2906_p11 = pneg %p2905_p8 }
  0x74   : > { %p2913_p9 = pnand %p2912_p6, %p2906_p11 }
  0x76   : > { %2916 = shalt.err (!%p2913_p9)
}
  0x77   : > { %2635 = dma.hbm_to_vmem [thread:$0]  (!%p3152_p12), %s3522_s5, 1024, %s339_s20, [#allocation8], %s3024_s24, %s3024_s24, %s3025_s26  }
  0x78   : > { %s2917_s30 = scalar_lea.hbm %s3526_s9, 3072 }
  0x79   : > { %p2918_p5 = scmp.ne.s32.totalorder %s3526_s9, %s2917_s30  ;;  %p2924_p3 = scmp.lt.u32.totalorder %s2917_s30, %s3526_s9 }
  0x7b   : > { %p2920_p10 = pnand %p2918_p5, %p3168_p0 }
  0x7d   : > { %p2921_p2 = pneg %p2920_p10 }
  0x7f   : > { %p2926_p4 = pnand %p2924_p3, %p2921_p2 }
  0x81   : > { %2929 = shalt.err (!%p2926_p4)
}
  0x82   : > { %s2930_s15 = scalar_lea.vmem %s371_s25, 3072  ;;  %p2938_p13 = scmp.lt.s32.totalorder %s371_s25, %s371_s25 }
  0x83   : > { %p2931_p7 = scmp.ne.s32.totalorder %s371_s25, %s2930_s15  ;;  %p2939_p1 = scmp.lt.s32.totalorder %s2930_s15, %s2930_s15 }
  0x85   : > { %p2933_p8 = pnand %p2931_p7, %p3168_p0  ;;  %p2940_p6 = por %p2939_p1, %p2938_p13 }
  0x87   : > { %p2934_p11 = pneg %p2933_p8 }
  0x89   : > { %p2941_p9 = pnand %p2940_p6, %p2934_p11 }
  0x8b   : > { %2944 = shalt.err (!%p2941_p9)
}
  0x8c   : > { %2641 = dma.hbm_to_vmem [thread:$0]  (!%p3152_p12), %s3526_s9, 3072, %s371_s25, [#allocation11], %s3024_s24, %s3024_s24, %s3025_s26  }
  0x8d   : > { %p3553_p5 = scmp.ne.s32.totalorder %s3549_s29, 0 }
  0x8e   : > { %p3554_p0 = scmp.eq.s32.totalorder (!%p3553_p5), %s3114_s21, 0 }
  0x8f   : > { %397 = sbr.rel (%p3553_p5) target bundleno = 1254 (0x4e6), region = 64 }
  0x96   : > { %2990 = dma.done.wait (%p3554_p0), [#allocation5], 3072   ;;  %p3555_p10 = pmov %p3554_p0 }
  0x97   : > { %p3556_p2 = pmov %p3554_p0 }
  0x98   : > { %2992 = vsyncadd (%p3555_p10), [#allocation5], 4294964224 }
  0x99   : > { %2994 = dma.done.wait (%p3556_p2), [#allocation8], 4096   ;;  %p3557_p3 = pmov %p3554_p0 }
  0x9a   : > { %p3558_p4 = pmov %p3554_p0 }
  0x9b   : > { %2996 = vsyncadd (%p3557_p3), [#allocation8], 4294963200 }
  0x9c   : > { %2998 = dma.done.wait (%p3558_p4), [#allocation11], 6144   ;;  %p3559_p12 = pmov %p3554_p0 }
  0x9d   : > { %v3028_v0 = vmov 0.0   ;;  %vm3029_vm0 = vmmov 0   ;;  %v2700_v1 = vld [vmem:[#allocation9] sm:$0xff]   ;;  %v2702_v3 = vld [vmem:[#allocation9 + $0x8] sm:$0xff]   ;;  %p453_p7 = scmp.lt.s32.totalorder %s3114_s21, 1  ;;  %v2704_v5 = vld [vmem:[#allocation9 + $0x10] sm:$0xff]  }
  0x9e   : > { %3000 = vsyncadd (%p3559_p12), [#allocation11], 4294961152  ;;  %2344 = vmatprep.subr.bf16.mxu0 %v3028_v0  ;;  %459 = vst [vmem:[#allocation2] sm:$0xff] %v3028_v0  ;;  %2364 = vmatprep.subr.bf16.mxu1 %v3028_v0  ;;  %v2701_v2 = vld [vmem:[#allocation4 + $0x40] sm:$0xff]   ;;  %v2703_v4 = vld [vmem:[#allocation4 + $0x48] sm:$0xff]   ;;  %vm464_vm1 = vcmask 31744  }
  0x9f   : > { %460 = vst [vmem:[#allocation2 + $0x8] sm:$0xff] %v3028_v0  ;;  %461 = vst [vmem:[#allocation2 + $0x10] sm:$0xff] %v3028_v0  ;;  %2360 = vmatprep.mubr.msk.bf16.mxu0 %vm3029_vm0, %v3028_v0  ;;  %2380 = vmatprep.mubr.msk.bf16.mxu1 %vm3029_vm0, %v3028_v0  ;;  %s454_s23 = scalar_select %p453_p7, %s3114_s21, 1  ;;  %v2705_v6 = vld [vmem:[#allocation4 + $0x50] sm:$0xff]   ;;  %v2706_v7 = vld [vmem:[#allocation9 + $0x18] sm:$0xff]  }
  0xa0   : > { %2345 = vmatpush3.bf16.msra.mxu0 %v2700_v1  ;;  %2365 = vmatpush3.bf16.msra.mxu1 %v2701_v2  ;;  %v2707_v8 = vld [vmem:[#allocation4 + $0x58] sm:$0xff]   ;;  %v2708_v9 = vld [vmem:[#allocation9 + $0x20] sm:$0xff]   ;;  %v2710_v13 = vld [vmem:[#allocation9 + $0x28] sm:$0xff]   ;;  %s450_s19 = sand.u32 1, %s3011_s18   ;;  %s2226_s22 = sshll.u32 %s3114_s21, 8 }
  0xa1   : > { %2346 = vmatprep.subr.bf16.mxu0 %v3028_v0  ;;  %2366 = vmatprep.subr.bf16.mxu1 %v3028_v0  ;;  %s2225_s29 = sshll.u32 %s454_s23, 4  ;;  %v2709_v10 = vld [vmem:[#allocation4 + $0x60] sm:$0xff]   ;;  %v2711_v14 = vld [vmem:[#allocation4 + $0x68] sm:$0xff]   ;;  %v2712_v15 = vld [vmem:[#allocation9 + $0x30] sm:$0xff]   ;;  %s2108_s20 = sshll.u32 %s450_s19, 4 }
  0xa2   : > { %s457_s26 = scalar_lea.vmem %s3517_s0, %s2225_s29  ;;  %v2713_v16 = vld [vmem:[#allocation4 + $0x70] sm:$0xff]   ;;  %v2714_v17 = vld [vmem:[#allocation9 + $0x38] sm:$0xff]   ;;  %v2716_v25 = vld [vmem:[#allocation4] sm:$0xff]   ;;  %s452_s23 = scalar_lea.vmem [#allocation13], %s2108_s20 }
  0xa3   : > { %v462_v11 = vld [vmem:[%s457_s26] sm:$0xff]  ;;  %v463_v12 = vld [vmem:[%s457_s26 + $0x8] sm:$0xff]  ;;  %v2715_v18 = vld [vmem:[#allocation4 + $0x78] sm:$0xff]   ;;  %s1982_s29 = sshll.u32 %s452_s23, 4  ;;  %s3560_s26 = sld [smem:[#allocation25_spill]]  ;;  %s3474_s29 = int_to_ptr.vmem [resolvable:$true] %s1982_s29 }
  0xa4   : > { %2347 = vmatpush3.bf16.msra.mxu0 %v2702_v3  ;;  %2367 = vmatpush3.bf16.msra.mxu1 %v2703_v4  ;;  %465 = vst.msk [vmem:[#allocation2 + $0x8] sm:$0xff] %vm464_vm1, %v462_v11  ;;  %466 = vst.msk [vmem:[#allocation2 + $0x10] sm:$0xff] %vm464_vm1, %v463_v12  ;;  %v2717_v26 = vld [vmem:[#allocation4 + $0x80] sm:$0xff]   ;;  %v2718_v27 = vld [vmem:[#allocation4 + $0x8] sm:$0xff]   ;;  %s3476_s21 = scalar_lea.sflag [#allocation6], %s450_s19  ;;  %s2945_s3 = scalar_lea.vmem %s3474_s29, 256 }
  0xa5   : > { %2348 = vmatprep.subr.bf16.mxu0 %v3028_v0  ;;  %2368 = vmatprep.subr.bf16.mxu1 %v3028_v0  ;;  %v2719_v28 = vld [vmem:[#allocation4 + $0x88] sm:$0xff]   ;;  %v2720_v29 = vld [vmem:[#allocation4 + $0x10] sm:$0xff]   ;;  %v2722_v31 = vld [vmem:[#allocation4 + $0x18] sm:$0xff]   ;;  %p2946_p8 = scmp.ne.s32.totalorder %s3474_s29, %s2945_s3  ;;  %p3561_p11 = scmp.ne.s32.totalorder %s3546_s27, 0 }
  0xa6   : > { %v2721_v30 = vld [vmem:[#allocation4 + $0x90] sm:$0xff]   ;;  %v2723_v32 = vld [vmem:[#allocation4 + $0x98] sm:$0xff]   ;;  %v2724_v33 = vld [vmem:[#allocation4 + $0x20] sm:$0xff]   ;;  %s3030_s11 = smov [#allocation13]  }
  0xa7   : > { %v2725_v34 = vld [vmem:[#allocation4 + $0xa0] sm:$0xff]   ;;  %v2726_v35 = vld [vmem:[#allocation4 + $0x28] sm:$0xff]   ;;  %v2728_v37 = vld [vmem:[#allocation4 + $0x30] sm:$0xff]   ;;  %p2947_p13 = pnand %p2946_p8, %p3561_p11  ;;  %s2949_s17 = sshll.u32 %s3030_s11, 4  ;;  %s2950_s17 = int_to_ptr.vmem [resolvable:$false] %s2949_s17 }
  0xa8   : > { %2349 = vmatpush3.bf16.msra.mxu0 %v2704_v5  ;;  %2369 = vmatpush3.bf16.msra.mxu1 %v2705_v6  ;;  %v2727_v36 = vld [vmem:[#allocation4 + $0xa8] sm:$0xff]   ;;  %v2729_v38 = vld [vmem:[#allocation4 + $0xb0] sm:$0xff]   ;;  %v2730_v39 = vld [vmem:[#allocation4 + $0x38] sm:$0xff]   ;;  %s2951_s28 = scalar_lea.vmem %s2950_s17, 512  ;;  %p2952_p6 = scmp.lt.s32.totalorder %s3474_s29, %s2950_s17 }
  0xa9   : > { %2350 = vmatprep.subr.bf16.mxu0 %v3028_v0  ;;  %2370 = vmatprep.subr.bf16.mxu1 %v3028_v0  ;;  %v2731_v42 = vld [vmem:[#allocation4 + $0xb8] sm:$0xff]   ;;  %v2732_v44 = vld [vmem:[#allocation7 + $0x40] sm:$0xff]   ;;  %v2734_v46 = vld [vmem:[#allocation7 + $0x48] sm:$0xff]   ;;  %s3472_s25 = scalar_lea.hbm %s3560_s26, %s2226_s22  ;;  %p2948_p1 = pneg %p2947_p13 }
  0xaa   : > { %v2733_v45 = vld [vmem:[#allocation7] sm:$0xff]   ;;  %v2735_v47 = vld [vmem:[#allocation7 + $0x8] sm:$0xff]   ;;  %v2736_v48 = vld [vmem:[#allocation7 + $0x50] sm:$0xff]   ;;  %p2953_p9 = scmp.lt.s32.totalorder %s2951_s28, %s2945_s3 }
  0xab   : > { %v467_v19 = vld [vmem:[#allocation2 + $0x8] sm:$0xff]  ;;  %v468_v20 = vld [vmem:[#allocation2 + $0x10] sm:$0xff]  ;;  %v2740_v52 = vld [vmem:[#allocation7 + $0x60] sm:$0xff]  }
  0xac   : > { %2351 = vmatpush3.bf16.msra.mxu0 %v2706_v7  ;;  %2371 = vmatpush3.bf16.msra.mxu1 %v2707_v8  ;;  %v603_v21 = vld [vmem:[#allocation2 + $0x7] sm:$0xff]  ;;  %v604_v22 = vld [vmem:[#allocation2 + $0xf] sm:$0xff]  ;;  %v469_v23 = vpack.c.bf16 %v468_v20, %v467_v19  ;;  %v2741_v53 = vld [vmem:[#allocation7 + $0x20] sm:$0xff]   ;;  %p2954_p5 = por %p2953_p9, %p2952_p6 }
  0xad   : > { %2352 = vmatprep.subr.bf16.mxu0 %v3028_v0  ;;  %2372 = vmatprep.subr.bf16.mxu1 %v3028_v0  ;;  %v605_v24 = vpack.c.bf16 %v604_v22, %v603_v21  ;;  %v584_v40 = vld [vmem:[#allocation2 + $0x6] sm:$0xff]  ;;  %v585_v41 = vld [vmem:[#allocation2 + $0xe] sm:$0xff] }
  0xae   : > { %v586_v43 = vpack.c.bf16 %v585_v41, %v584_v40  ;;  %v2737_v49 = vld [vmem:[#allocation7 + $0x10] sm:$0xff]   ;;  %v2738_v50 = vld [vmem:[#allocation7 + $0x58] sm:$0xff]   ;;  %v2742_v54 = vld [vmem:[#allocation7 + $0x68] sm:$0xff]   ;;  %p2955_p0 = pnand %p2954_p5, %p2948_p1 }
  0xaf   : > { %v2739_v51 = vld [vmem:[#allocation7 + $0x18] sm:$0xff]   ;;  %v2743_v55 = vld [vmem:[#allocation7 + $0x28] sm:$0xff]   ;;  %v2744_v56 = vld [vmem:[#allocation7 + $0x70] sm:$0xff]  }
  0xb0   : > { %2353 = vmatpush3.bf16.msra.mxu0 %v2708_v9  ;;  %2373 = vmatpush3.bf16.msra.mxu1 %v2709_v10  ;;  %v2745_v57 = vld [vmem:[#allocation7 + $0x30] sm:$0xff]   ;;  %v2746_v58 = vld [vmem:[#allocation7 + $0x78] sm:$0xff]   ;;  %v2144_v9 = vld [vmem:[%s3519_s2] ss:$0 sm:$0xff] }
  0xb1   : > { %2354 = vmatprep.subr.bf16.mxu0 %v3028_v0  ;;  %2374 = vmatprep.subr.bf16.mxu1 %v3028_v0  ;;  %v2747_v59 = vld [vmem:[#allocation7 + $0x38] sm:$0xff]   ;;  %v2759_v40 = vld [vmem:[#allocation10 + $0x8] sm:$0xff]   ;;  %v2760_v41 = vld [vmem:[#allocation10 + $0x50] sm:$0xff]  }
  0xb4   : > { %2355 = vmatpush3.bf16.msra.mxu0 %v2710_v13  ;;  %2375 = vmatpush3.bf16.msra.mxu1 %v2711_v14 }
  0xb5   : > { %2356 = vmatprep.subr.bf16.mxu0 %v3028_v0  ;;  %2376 = vmatprep.subr.bf16.mxu1 %v3028_v0 }
  0xb8   : > { %2357 = vmatpush3.bf16.msra.mxu0 %v2712_v15  ;;  %2377 = vmatpush3.bf16.msra.mxu1 %v2713_v16 }
  0xb9   : > { %2358 = vmatprep.subr.bf16.mxu0 %v3028_v0  ;;  %2378 = vmatprep.subr.bf16.mxu1 %v3028_v0 }
  0xbc   : > { %2359 = vmatpush3.bf16.msra.mxu0 %v2714_v17  ;;  %2379 = vmatpush3.bf16.msra.mxu1 %v2715_v18 }
  0xbd   : > { %2384 = vmatprep.subr.bf16.mxu0 %v3028_v0  ;;  %2404 = vmatprep.subr.bf16.mxu1 %v3028_v0 }
  0xbf   : > { %2361 = vmatmul.mubr.bf16.vlgmr.msra.gmra.mrb[0].mxu0 %v469_v23  ;;  %2381 = vmatmul.mubr.bf16.vlgmr.msra.gmra.mrb[0].mxu1 %v605_v24  ;;  %v2748_v24 = vld [vmem:[#allocation7 + $0x80] sm:$0xff]  }
  0xc0   : > { %2385 = vmatpush3.bf16.msra.mxu0 %v2716_v25  ;;  %2405 = vmatpush3.bf16.msra.mxu1 %v2717_v26 }
  0xc1   : > { %2386 = vmatprep.subr.bf16.mxu0 %v3028_v0  ;;  %2406 = vmatprep.subr.bf16.mxu1 %v3028_v0 }
  0xc2   : > { %2400 = vmatprep.mubr.msk.bf16.mxu0 %vm3029_vm0, %v3028_v0  ;;  %2420 = vmatprep.mubr.msk.bf16.mxu1 %vm3029_vm0, %v3028_v0 }
  0xc4   : > { %2387 = vmatpush3.bf16.msra.mxu0 %v2718_v27  ;;  %2407 = vmatpush3.bf16.msra.mxu1 %v2719_v28 }
  0xc5   : > { %2388 = vmatprep.subr.bf16.mxu0 %v3028_v0  ;;  %2408 = vmatprep.subr.bf16.mxu1 %v3028_v0 }
  0xc8   : > { %2389 = vmatpush3.bf16.msra.mxu0 %v2720_v29  ;;  %2409 = vmatpush3.bf16.msra.mxu1 %v2721_v30  ;;  %v2749_v30 = vld [vmem:[#allocation7 + $0x88] sm:$0xff]  }
  0xc9   : > { %2390 = vmatprep.subr.bf16.mxu0 %v3028_v0  ;;  %2410 = vmatprep.subr.bf16.mxu1 %v3028_v0 }
  0xcc   : > { %2391 = vmatpush3.bf16.msra.mxu0 %v2722_v31  ;;  %2411 = vmatpush3.bf16.msra.mxu1 %v2723_v32  ;;  %v2750_v31 = vld [vmem:[#allocation7 + $0x90] sm:$0xff]   ;;  %v2751_v32 = vld [vmem:[#allocation7 + $0x98] sm:$0xff]  }
  0xcd   : > { %2392 = vmatprep.subr.bf16.mxu0 %v3028_v0  ;;  %2412 = vmatprep.subr.bf16.mxu1 %v3028_v0 }
  0xd0   : > { %2393 = vmatpush3.bf16.msra.mxu0 %v2724_v33  ;;  %2413 = vmatpush3.bf16.msra.mxu1 %v2725_v34  ;;  %v2752_v33 = vld [vmem:[#allocation7 + $0xa0] sm:$0xff]   ;;  %v2753_v34 = vld [vmem:[#allocation7 + $0xa8] sm:$0xff]  }
  0xd1   : > { %2394 = vmatprep.subr.bf16.mxu0 %v3028_v0  ;;  %2414 = vmatprep.subr.bf16.mxu1 %v3028_v0 }
  0xd4   : > { %2395 = vmatpush3.bf16.msra.mxu0 %v2726_v35  ;;  %2415 = vmatpush3.bf16.msra.mxu1 %v2727_v36  ;;  %v2754_v35 = vld [vmem:[#allocation7 + $0xb0] sm:$0xff]   ;;  %v2755_v36 = vld [vmem:[#allocation7 + $0xb8] sm:$0xff]  }
  0xd5   : > { %2396 = vmatprep.subr.bf16.mxu0 %v3028_v0  ;;  %2416 = vmatprep.subr.bf16.mxu1 %v3028_v0 }
  0xd8   : > { %2397 = vmatpush3.bf16.msra.mxu0 %v2728_v37  ;;  %2417 = vmatpush3.bf16.msra.mxu1 %v2729_v38  ;;  %v2756_v37 = vld [vmem:[#allocation10 + $0x40] sm:$0xff]  }
  0xd9   : > { %2398 = vmatprep.subr.bf16.mxu0 %v3028_v0  ;;  %2418 = vmatprep.subr.bf16.mxu1 %v3028_v0  ;;  %v2757_v38 = vld [vmem:[#allocation10] sm:$0xff]  }
  0xdc   : > { %2399 = vmatpush3.bf16.msra.mxu0 %v2730_v39  ;;  %2419 = vmatpush3.bf16.msra.mxu1 %v2731_v42  ;;  %v2758_v39 = vld [vmem:[#allocation10 + $0x48] sm:$0xff]   ;;  %v2761_v42 = vld [vmem:[#allocation10 + $0x10] sm:$0xff]  }
  0xdd   : > { %2424 = vmatprep.subr.bf16.mxu0 %v3028_v0  ;;  %2444 = vmatprep.subr.bf16.mxu1 %v3028_v0 }
  0xdf   : > { %2401 = vmatmul.mubr.bf16.vlgmr.msra.gmra.mrb[4].mxu0 %v586_v43  ;;  %2421 = vmatmul.mubr.bf16.vlgmr.msra.gmra.mrb[4].mxu1 %v469_v23  ;;  %v2762_v43 = vld [vmem:[#allocation10 + $0x58] sm:$0xff]  }
  0xe0   : > { %2440 = vmatprep.mubr.msk.bf16.mxu0 %vm3029_vm0, %v3028_v0  ;;  %2460 = vmatprep.mubr.msk.bf16.mxu1 %vm3029_vm0, %v3028_v0 }
  0xe1   : > { %2425 = vmatpush3.bf16.msra.mxu0 %v2732_v44  ;;  %2445 = vmatpush3.bf16.msra.mxu1 %v2733_v45  ;;  %v2763_v44 = vld [vmem:[#allocation10 + $0x18] sm:$0xff]   ;;  %v2764_v45 = vld [vmem:[#allocation10 + $0x60] sm:$0xff]  }
  0xe2   : > { %2426 = vmatprep.subr.bf16.mxu0 %v3028_v0  ;;  %2446 = vmatprep.subr.bf16.mxu1 %v3028_v0 }
  0xe5   : > { %2427 = vmatpush3.bf16.msra.mxu0 %v2734_v46  ;;  %2447 = vmatpush3.bf16.msra.mxu1 %v2735_v47  ;;  %v2765_v46 = vld [vmem:[#allocation10 + $0x20] sm:$0xff]   ;;  %v2766_v47 = vld [vmem:[#allocation10 + $0x68] sm:$0xff]  }
  0xe6   : > { %2428 = vmatprep.subr.bf16.mxu0 %v3028_v0  ;;  %2448 = vmatprep.subr.bf16.mxu1 %v3028_v0 }
  0xe9   : > { %2429 = vmatpush3.bf16.msra.mxu0 %v2736_v48  ;;  %2449 = vmatpush3.bf16.msra.mxu1 %v2737_v49  ;;  %v2767_v48 = vld [vmem:[#allocation10 + $0x28] sm:$0xff]   ;;  %v2768_v49 = vld [vmem:[#allocation10 + $0x70] sm:$0xff]  }
  0xea   : > { %2430 = vmatprep.subr.bf16.mxu0 %v3028_v0  ;;  %2450 = vmatprep.subr.bf16.mxu1 %v3028_v0 }
  0xed   : > { %2431 = vmatpush3.bf16.msra.mxu0 %v2738_v50  ;;  %2451 = vmatpush3.bf16.msra.mxu1 %v2739_v51  ;;  %v2769_v50 = vld [vmem:[#allocation10 + $0x30] sm:$0xff]   ;;  %v2770_v51 = vld [vmem:[#allocation10 + $0x78] sm:$0xff]  }
  0xee   : > { %2432 = vmatprep.subr.bf16.mxu0 %v3028_v0  ;;  %2452 = vmatprep.subr.bf16.mxu1 %v3028_v0 }
  0xf1   : > { %2433 = vmatpush3.bf16.msra.mxu0 %v2740_v52  ;;  %2453 = vmatpush3.bf16.msra.mxu1 %v2741_v53  ;;  %v2771_v52 = vld [vmem:[#allocation10 + $0x38] sm:$0xff]  }
  0xf2   : > { %2434 = vmatprep.subr.bf16.mxu0 %v3028_v0  ;;  %2454 = vmatprep.subr.bf16.mxu1 %v3028_v0 }
  0xf5   : > { %2435 = vmatpush3.bf16.msra.mxu0 %v2742_v54  ;;  %2455 = vmatpush3.bf16.msra.mxu1 %v2743_v55 }
  0xf6   : > { %2436 = vmatprep.subr.bf16.mxu0 %v3028_v0  ;;  %2456 = vmatprep.subr.bf16.mxu1 %v3028_v0 }
  0xf9   : > { %2437 = vmatpush3.bf16.msra.mxu0 %v2744_v56  ;;  %2457 = vmatpush3.bf16.msra.mxu1 %v2745_v57 }
  0xfa   : > { %2438 = vmatprep.subr.bf16.mxu0 %v3028_v0  ;;  %2458 = vmatprep.subr.bf16.mxu1 %v3028_v0 }
  0xfd   : > { %2439 = vmatpush3.bf16.msra.mxu0 %v2746_v58  ;;  %2459 = vmatpush3.bf16.msra.mxu1 %v2747_v59 }
  0xfe   : > { %2464 = vmatprep.subr.bf16.mxu0 %v3028_v0  ;;  %2484 = vmatprep.subr.bf16.mxu1 %v3028_v0 }
 0x192   : > { %v3366_v60 = vpop.f32.mrb[0].mxu0  ;;  %v705_v61 = vpop.f32.mrb[0].mxu1 }
 0x193   : > { %v2362_v62 = vpop.f32.mrb[1].mxu0  ;;  %v2382_v63 = vpop.f32.mrb[1].mxu1 }
 0x194   : > { %v3368_v1 = vpop.f32.mrb[2].mxu0  ;;  %v708_v2 = vpop.f32.mrb[2].mxu1 }
 0x195   : > { %v2363_v3 = vpop.f32.mrb[3].mxu0  ;;  %v2383_v4 = vpop.f32.mrb[3].mxu1 }
 0x196   : > { %v2169_v3 = vld [vmem:[%s3521_s4] ss:$0 sm:$0xff] }
 0x1b2   : > { %v794_v5 = vpop.f32.mrb[4].mxu0  ;;  %v903_v7 = vpop.f32.mrb[4].mxu1 }
 0x1b3   : > { %v795_v6 = vadd.f32 %v794_v5, %v705_v61  ;;  %v2402_v8 = vpop.f32.mrb[5].mxu0  ;;  %v2422_v10 = vpop.f32.mrb[5].mxu1 }
 0x1b4   : > { %v797_v11 = vpop.f32.mrb[6].mxu0  ;;  %v906_v14 = vpop.f32.mrb[6].mxu1 }
 0x1b5   : > { %v910_v12 = vadd.f32 %v903_v7, %v795_v6  ;;  %v798_v13 = vadd.f32 %v797_v11, %v708_v2  ;;  %v2403_v15 = vpop.f32.mrb[7].mxu0  ;;  %v2423_v16 = vpop.f32.mrb[7].mxu1 }
 0x1b7   : > { %v919_v17 = vadd.f32 %v2144_v9, %v910_v12  ;;  %v911_v18 = vadd.f32 %v906_v14, %v798_v13 }
 0x1b9   : > { %v921_v19 = vmax.f32 %v919_v17, 0.0  ;;  %v920_v20 = vadd.f32 %v2144_v9, %v911_v18 }
 0x1bb   : > { %923 = vst [vmem:[#allocation2 + $0x8] sm:$0xff] %v921_v19  ;;  %v922_v21 = vmax.f32 %v920_v20, 0.0  ;;  %v2772_v20 = vld [vmem:[#allocation10 + $0x80] sm:$0xff]  }
 0x1bd   : > { %924 = vst [vmem:[#allocation2 + $0x10] sm:$0xff] %v922_v21  ;;  %v1144_v22 = vpack.c.bf16 %v922_v21, %v921_v19 }
 0x1c2   : > { %v944_v23 = vld [vmem:[#allocation2 + $0x7] sm:$0xff] }
 0x1c3   : > { %v925_v26 = vld [vmem:[#allocation2 + $0x6] sm:$0xff] }
 0x1c4   : > { %v945_v25 = vld [vmem:[#allocation2 + $0xf] sm:$0xff] }
 0x1c5   : > { %v926_v27 = vld [vmem:[#allocation2 + $0xe] sm:$0xff]  ;;  %v946_v28 = vpack.c.bf16 %v945_v25, %v944_v23  ;;  %v3417_v25 = vld [vmem:[#allocation2] sm:$0xff] }
 0x1c6   : > { %v927_v29 = vpack.c.bf16 %v926_v27, %v925_v26  ;;  %v2774_v26 = vld [vmem:[#allocation10 + $0x90] sm:$0xff]   ;;  %v2775_v27 = vld [vmem:[#allocation10 + $0x98] sm:$0xff]  }
 0x1c7   : > { %2441 = vmatmul.mubr.bf16.vlgmr.msra.gmra.mrb[8].mxu0 %v946_v28  ;;  %v2776_v28 = vld [vmem:[#allocation10 + $0xa0] sm:$0xff]  }
 0x1c8   : > { %2461 = vmatmul.mubr.bf16.vlgmr.msra.gmra.mrb[8].mxu1 %v927_v29  ;;  %2465 = vmatpush3.bf16.msra.mxu0 %v2748_v24  ;;  %v2777_v29 = vld [vmem:[#allocation10 + $0xa8] sm:$0xff]  }
 0x1c9   : > { %2480 = vmatprep.mubr.msk.bf16.mxu0 %vm3029_vm0, %v3028_v0  ;;  %2466 = vmatprep.subr.bf16.mxu0 %v3028_v0 }
 0x1ca   : > { %2500 = vmatprep.mubr.msk.bf16.mxu1 %vm3029_vm0, %v3028_v0  ;;  %2485 = vmatpush3.bf16.msra.mxu1 %v2756_v37  ;;  %v2784_v37 = vld [vmem:[#allocation12 + $0x50] sm:$0xff]  }
 0x1cb   : > { %2486 = vmatprep.subr.bf16.mxu1 %v3028_v0 }
 0x1cc   : > { %2467 = vmatpush3.bf16.msra.mxu0 %v2749_v30  ;;  %v2778_v30 = vld [vmem:[#allocation10 + $0xb0] sm:$0xff]  }
 0x1cd   : > { %2468 = vmatprep.subr.bf16.mxu0 %v3028_v0 }
 0x1ce   : > { %2487 = vmatpush3.bf16.msra.mxu1 %v2758_v39  ;;  %v2786_v39 = vld [vmem:[#allocation12 + $0x58] sm:$0xff]  }
 0x1cf   : > { %2488 = vmatprep.subr.bf16.mxu1 %v3028_v0 }
 0x1d0   : > { %2469 = vmatpush3.bf16.msra.mxu0 %v2750_v31  ;;  %v2779_v31 = vld [vmem:[#allocation10 + $0xb8] sm:$0xff]  }
 0x1d1   : > { %2470 = vmatprep.subr.bf16.mxu0 %v3028_v0 }
 0x1d2   : > { %2489 = vmatpush3.bf16.msra.mxu1 %v2760_v41  ;;  %v2788_v41 = vld [vmem:[#allocation12 + $0x60] sm:$0xff]  }
 0x1d3   : > { %2490 = vmatprep.subr.bf16.mxu1 %v3028_v0 }
 0x1d4   : > { %2471 = vmatpush3.bf16.msra.mxu0 %v2751_v32 }
 0x1d5   : > { %2472 = vmatprep.subr.bf16.mxu0 %v3028_v0 }
 0x1d6   : > { %2491 = vmatpush3.bf16.msra.mxu1 %v2762_v43  ;;  %v2790_v43 = vld [vmem:[#allocation12 + $0x68] sm:$0xff]  }
 0x1d7   : > { %2492 = vmatprep.subr.bf16.mxu1 %v3028_v0 }
 0x1d8   : > { %2473 = vmatpush3.bf16.msra.mxu0 %v2752_v33  ;;  %v2780_v33 = vld [vmem:[#allocation12 + $0x40] sm:$0xff]  }
 0x1d9   : > { %2474 = vmatprep.subr.bf16.mxu0 %v3028_v0 }
 0x1da   : > { %2493 = vmatpush3.bf16.msra.mxu1 %v2764_v45  ;;  %v2792_v45 = vld [vmem:[#allocation12 + $0x70] sm:$0xff]  }
 0x1db   : > { %2494 = vmatprep.subr.bf16.mxu1 %v3028_v0 }
 0x1dc   : > { %2475 = vmatpush3.bf16.msra.mxu0 %v2753_v34  ;;  %v2781_v34 = vld [vmem:[#allocation12] sm:$0xff]  }
 0x1dd   : > { %2476 = vmatprep.subr.bf16.mxu0 %v3028_v0 }
 0x1de   : > { %2495 = vmatpush3.bf16.msra.mxu1 %v2766_v47  ;;  %v2794_v47 = vld [vmem:[#allocation12 + $0x78] sm:$0xff]  }
 0x1df   : > { %2496 = vmatprep.subr.bf16.mxu1 %v3028_v0 }
 0x1e0   : > { %2477 = vmatpush3.bf16.msra.mxu0 %v2754_v35  ;;  %v2782_v35 = vld [vmem:[#allocation12 + $0x48] sm:$0xff]  }
 0x1e1   : > { %2478 = vmatprep.subr.bf16.mxu0 %v3028_v0 }
 0x1e2   : > { %2497 = vmatpush3.bf16.msra.mxu1 %v2768_v49 }
 0x1e3   : > { %2498 = vmatprep.subr.bf16.mxu1 %v3028_v0 }
 0x1e4   : > { %2479 = vmatpush3.bf16.msra.mxu0 %v2755_v36  ;;  %v2783_v36 = vld [vmem:[#allocation12 + $0x8] sm:$0xff]  }
 0x1e5   : > { %2504 = vmatprep.subr.bf16.mxu0 %v3028_v0 }
 0x1e6   : > { %2499 = vmatpush3.bf16.msra.mxu1 %v2770_v51 }
 0x1e7   : > { %2481 = vmatmul.mubr.bf16.vlgmr.msra.gmra.mrb[12].mxu0 %v1144_v22  ;;  %2524 = vmatprep.subr.bf16.mxu1 %v3028_v0 }
 0x1e8   : > { %2520 = vmatprep.mubr.msk.bf16.mxu0 %vm3029_vm0, %v3028_v0  ;;  %2505 = vmatpush3.bf16.msra.mxu0 %v2757_v38  ;;  %v2785_v38 = vld [vmem:[#allocation12 + $0x10] sm:$0xff]  }
 0x1e9   : > { %2506 = vmatprep.subr.bf16.mxu0 %v3028_v0 }
 0x1ec   : > { %2507 = vmatpush3.bf16.msra.mxu0 %v2759_v40  ;;  %v2787_v40 = vld [vmem:[#allocation12 + $0x18] sm:$0xff]  }
 0x1ed   : > { %2508 = vmatprep.subr.bf16.mxu0 %v3028_v0 }
 0x1f0   : > { %2509 = vmatpush3.bf16.msra.mxu0 %v2761_v42  ;;  %v2789_v42 = vld [vmem:[#allocation12 + $0x20] sm:$0xff]  }
 0x1f1   : > { %2510 = vmatprep.subr.bf16.mxu0 %v3028_v0 }
 0x1f4   : > { %2511 = vmatpush3.bf16.msra.mxu0 %v2763_v44  ;;  %v2791_v44 = vld [vmem:[#allocation12 + $0x28] sm:$0xff]  }
 0x1f5   : > { %2512 = vmatprep.subr.bf16.mxu0 %v3028_v0 }
 0x1f8   : > { %2513 = vmatpush3.bf16.msra.mxu0 %v2765_v46  ;;  %v2793_v46 = vld [vmem:[#allocation12 + $0x30] sm:$0xff]  }
 0x1f9   : > { %2514 = vmatprep.subr.bf16.mxu0 %v3028_v0 }
 0x1fc   : > { %2515 = vmatpush3.bf16.msra.mxu0 %v2767_v48  ;;  %v2795_v48 = vld [vmem:[#allocation12 + $0x38] sm:$0xff]  }
 0x1fd   : > { %2516 = vmatprep.subr.bf16.mxu0 %v3028_v0 }
 0x200   : > { %2517 = vmatpush3.bf16.msra.mxu0 %v2769_v50 }
 0x201   : > { %2518 = vmatprep.subr.bf16.mxu0 %v3028_v0 }
 0x204   : > { %2519 = vmatpush3.bf16.msra.mxu0 %v2771_v52 }
 0x205   : > { %2544 = vmatprep.subr.bf16.mxu0 %v3028_v0  ;;  %v2111_v0 = vld [vmem:[%s3523_s6] ss:$0 sm:$0xff] }
 0x206   : > { %v576_v10 = vadd.f32 %v2111_v0, %v3366_v60  ;;  %v579_v13 = vadd.f32 %v2111_v0, %v3368_v1  ;;  %v2773_v1 = vld [vmem:[#allocation10 + $0x88] sm:$0xff]  }
 0x29a   : > { %v1046_v53 = vpop.f32.mrb[8].mxu0 }
 0x29b   : > { %v1135_v54 = vpop.f32.mrb[8].mxu1  ;;  %v2442_v56 = vpop.f32.mrb[9].mxu0 }
 0x29c   : > { %v1136_v55 = vadd.f32 %v1135_v54, %v1046_v53  ;;  %v2462_v57 = vpop.f32.mrb[9].mxu1  ;;  %v1049_v58 = vpop.f32.mrb[10].mxu0 }
 0x29d   : > { %v1138_v59 = vpop.f32.mrb[10].mxu1  ;;  %v2443_v62 = vpop.f32.mrb[11].mxu0 }
 0x29e   : > { %v1139_v61 = vadd.f32 %v1138_v59, %v1049_v58  ;;  %v2463_v63 = vpop.f32.mrb[11].mxu1 }
 0x2ba   : > { %v1244_v2 = vpop.f32.mrb[12].mxu0 }
 0x2bb   : > { %v1251_v4 = vadd.f32 %v1244_v2, %v1136_v55  ;;  %v2482_v5 = vpop.f32.mrb[13].mxu0 }
 0x2bc   : > { %v1247_v6 = vpop.f32.mrb[14].mxu0 }
 0x2bd   : > { %v1260_v7 = vadd.f32 %v2169_v3, %v1251_v4  ;;  %v1252_v8 = vadd.f32 %v1247_v6, %v1139_v61  ;;  %v2483_v9 = vpop.f32.mrb[15].mxu0  ;;  %v2194_v61 = vld [vmem:[%s3525_s8] ss:$0 sm:$0xff] }
 0x2bf   : > { %v1262_v11 = vmax.f32 %v1260_v7, 0.0  ;;  %v1261_v12 = vadd.f32 %v2169_v3, %v1252_v8 }
 0x2c1   : > { %v1266_v14 = vadd.f32 %v1262_v11, %v576_v10  ;;  %v1263_v15 = vmax.f32 %v1261_v12, 0.0  ;;  %v2796_v10 = vld [vmem:[#allocation12 + $0x80] sm:$0xff]  }
 0x2c3   : > { %v3411_v16 = vmax.f32 %v1266_v14, 0.0  ;;  %v1267_v17 = vadd.f32 %v1263_v15, %v579_v13 }
 0x2c5   : > { %1270 = vst [vmem:[#allocation2 + $0x8] sm:$0xff] %v3411_v16  ;;  %v3414_v18 = vmax.f32 %v1267_v17, 0.0  ;;  %v2797_v17 = vld [vmem:[#allocation12 + $0x88] sm:$0xff]  }
 0x2c7   : > { %1271 = vst [vmem:[#allocation2 + $0x10] sm:$0xff] %v3414_v18  ;;  %v1495_v32 = vpack.c.bf16 %v3414_v18, %v3411_v16 }
 0x2cc   : > { %v1295_v19 = vld [vmem:[#allocation2 + $0x6] sm:$0xff] }
 0x2cd   : > { %v1276_v22 = vld [vmem:[#allocation2 + $0x4] sm:$0xff] }
 0x2ce   : > { %v1296_v21 = vld [vmem:[#allocation2 + $0xe] sm:$0xff] }
 0x2cf   : > { %v1277_v60 = vld [vmem:[#allocation2 + $0xc] sm:$0xff]  ;;  %v1297_v23 = vpack.c.bf16 %v1296_v21, %v1295_v19  ;;  %v2800_v21 = vld [vmem:[#allocation12 + $0xa0] sm:$0xff]  }
 0x2d0   : > { %v1278_v24 = vpack.c.bf16 %v1277_v60, %v1276_v22  ;;  %v2798_v19 = vld [vmem:[#allocation12 + $0x90] sm:$0xff]   ;;  %v2801_v22 = vld [vmem:[#allocation12 + $0xa8] sm:$0xff]  }
 0x2d1   : > { %2501 = vmatmul.mubr.bf16.vlgmr.msra.gmra.mrb[12].mxu1 %v1297_v23  ;;  %v2802_v60 = vld [vmem:[#allocation12 + $0xb0] sm:$0xff]   ;;  %v2803_v23 = vld [vmem:[#allocation12 + $0xb8] sm:$0xff]  }
 0x2d2   : > { %2521 = vmatmul.mubr.bf16.vlgmr.msra.gmra.mrb[16].mxu0 %v1278_v24  ;;  %2525 = vmatpush3.bf16.msra.mxu1 %v2772_v20  ;;  %v2799_v20 = vld [vmem:[#allocation12 + $0x98] sm:$0xff]  }
 0x2d3   : > { %2540 = vmatprep.mubr.msk.bf16.mxu1 %vm3029_vm0, %v3417_v25  ;;  %2526 = vmatprep.subr.bf16.mxu1 %v3417_v25 }
 0x2d4   : > { %2560 = vmatprep.mubr.msk.bf16.mxu0 %vm3029_vm0, %v3417_v25  ;;  %2545 = vmatpush3.bf16.msra.mxu0 %v2780_v33 }
 0x2d5   : > { %2546 = vmatprep.subr.bf16.mxu0 %v3417_v25 }
 0x2d6   : > { %2527 = vmatpush3.bf16.msra.mxu1 %v2773_v1 }
 0x2d7   : > { %2528 = vmatprep.subr.bf16.mxu1 %v3417_v25 }
 0x2d8   : > { %2547 = vmatpush3.bf16.msra.mxu0 %v2782_v35  ;;  %v2219_v35 = vld [vmem:[%s3527_s10] ss:$0 sm:$0xff] }
 0x2d9   : > { %2548 = vmatprep.subr.bf16.mxu0 %v3417_v25 }
 0x2da   : > { %2529 = vmatpush3.bf16.msra.mxu1 %v2774_v26 }
 0x2db   : > { %2530 = vmatprep.subr.bf16.mxu1 %v3417_v25 }
 0x2dc   : > { %2549 = vmatpush3.bf16.msra.mxu0 %v2784_v37 }
 0x2dd   : > { %2550 = vmatprep.subr.bf16.mxu0 %v3417_v25 }
 0x2de   : > { %2531 = vmatpush3.bf16.msra.mxu1 %v2775_v27 }
 0x2df   : > { %2532 = vmatprep.subr.bf16.mxu1 %v3417_v25 }
 0x2e0   : > { %2551 = vmatpush3.bf16.msra.mxu0 %v2786_v39 }
 0x2e1   : > { %2552 = vmatprep.subr.bf16.mxu0 %v3417_v25 }
 0x2e2   : > { %2533 = vmatpush3.bf16.msra.mxu1 %v2776_v28 }
 0x2e3   : > { %2534 = vmatprep.subr.bf16.mxu1 %v3417_v25 }
 0x2e4   : > { %2553 = vmatpush3.bf16.msra.mxu0 %v2788_v41 }
 0x2e5   : > { %2554 = vmatprep.subr.bf16.mxu0 %v3417_v25 }
 0x2e6   : > { %2535 = vmatpush3.bf16.msra.mxu1 %v2777_v29 }
 0x2e7   : > { %2536 = vmatprep.subr.bf16.mxu1 %v3417_v25 }
 0x2e8   : > { %2555 = vmatpush3.bf16.msra.mxu0 %v2790_v43 }
 0x2e9   : > { %2556 = vmatprep.subr.bf16.mxu0 %v3417_v25 }
 0x2ea   : > { %2537 = vmatpush3.bf16.msra.mxu1 %v2778_v30 }
 0x2eb   : > { %2538 = vmatprep.subr.bf16.mxu1 %v3417_v25 }
 0x2ec   : > { %2557 = vmatpush3.bf16.msra.mxu0 %v2792_v45 }
 0x2ed   : > { %2558 = vmatprep.subr.bf16.mxu0 %v3417_v25 }
 0x2ee   : > { %2539 = vmatpush3.bf16.msra.mxu1 %v2779_v31 }
 0x2ef   : > { %2564 = vmatprep.subr.bf16.mxu1 %v3417_v25 }
 0x2f0   : > { %2559 = vmatpush3.bf16.msra.mxu0 %v2794_v47 }
 0x2f1   : > { %2541 = vmatmul.mubr.bf16.vlgmr.msra.gmra.mrb[16].mxu1 %v1495_v32  ;;  %2584 = vmatprep.subr.bf16.mxu0 %v3417_v25 }
 0x2f2   : > { %2580 = vmatprep.mubr.msk.bf16.mxu1 %vm3029_vm0, %v3417_v25  ;;  %2565 = vmatpush3.bf16.msra.mxu1 %v2781_v34 }
 0x2f3   : > { %2566 = vmatprep.subr.bf16.mxu1 %v3417_v25 }
 0x2f6   : > { %2567 = vmatpush3.bf16.msra.mxu1 %v2783_v36 }
 0x2f7   : > { %2568 = vmatprep.subr.bf16.mxu1 %v3417_v25 }
 0x2fa   : > { %2569 = vmatpush3.bf16.msra.mxu1 %v2785_v38 }
 0x2fb   : > { %2570 = vmatprep.subr.bf16.mxu1 %v3417_v25 }
 0x2fe   : > { %2571 = vmatpush3.bf16.msra.mxu1 %v2787_v40 }
 0x2ff   : > { %2572 = vmatprep.subr.bf16.mxu1 %v3417_v25 }
 0x302   : > { %2573 = vmatpush3.bf16.msra.mxu1 %v2789_v42 }
 0x303   : > { %2574 = vmatprep.subr.bf16.mxu1 %v3417_v25 }
 0x306   : > { %2575 = vmatpush3.bf16.msra.mxu1 %v2791_v44 }
 0x307   : > { %2576 = vmatprep.subr.bf16.mxu1 %v3417_v25 }
 0x30a   : > { %2577 = vmatpush3.bf16.msra.mxu1 %v2793_v46 }
 0x30b   : > { %2578 = vmatprep.subr.bf16.mxu1 %v3417_v25 }
 0x30e   : > { %2579 = vmatpush3.bf16.msra.mxu1 %v2795_v48 }
 0x3a4   : > { %v1397_v49 = vpop.f32.mrb[12].mxu1 }
 0x3a5   : > { %v1486_v50 = vpop.f32.mrb[16].mxu0  ;;  %v2502_v52 = vpop.f32.mrb[13].mxu1 }
 0x3a6   : > { %v1487_v51 = vadd.f32 %v1486_v50, %v1397_v49  ;;  %v2522_v53 = vpop.f32.mrb[17].mxu0  ;;  %v1400_v54 = vpop.f32.mrb[14].mxu1 }
 0x3a7   : > { %v1489_v55 = vpop.f32.mrb[18].mxu0  ;;  %v2503_v57 = vpop.f32.mrb[15].mxu1 }
 0x3a8   : > { %v1490_v56 = vadd.f32 %v1489_v55, %v1400_v54  ;;  %v2523_v58 = vpop.f32.mrb[19].mxu0 }
 0x3c4   : > { %v1595_v59 = vpop.f32.mrb[16].mxu1 }
 0x3c5   : > { %v1602_v62 = vadd.f32 %v1595_v59, %v1487_v51  ;;  %v2542_v63 = vpop.f32.mrb[17].mxu1 }
 0x3c6   : > { %v1598_v2 = vpop.f32.mrb[18].mxu1 }
 0x3c7   : > { %v1611_v3 = vadd.f32 %v2194_v61, %v1602_v62  ;;  %v1603_v4 = vadd.f32 %v1598_v2, %v1490_v56  ;;  %v2543_v5 = vpop.f32.mrb[19].mxu1 }
 0x3c9   : > { %v1613_v0 = vmax.f32 %v1611_v3, 0.0  ;;  %v1612_v6 = vadd.f32 %v2194_v61, %v1603_v4 }
 0x3cb   : > { %1615 = vst [vmem:[#allocation2 + $0x8] sm:$0xff] %v1613_v0  ;;  %v1614_v7 = vmax.f32 %v1612_v6, 0.0 }
 0x3cd   : > { %1616 = vst [vmem:[#allocation2 + $0x10] sm:$0xff] %v1614_v7  ;;  %v1836_v8 = vpack.c.bf16 %v1614_v7, %v1613_v0 }
 0x3d2   : > { %v1636_v9 = vld [vmem:[#allocation2 + $0x6] sm:$0xff] }
 0x3d3   : > { %v1617_v12 = vld [vmem:[#allocation2 + $0x4] sm:$0xff] }
 0x3d4   : > { %v1637_v11 = vld [vmem:[#allocation2 + $0xe] sm:$0xff] }
 0x3d5   : > { %v1618_v13 = vld [vmem:[#allocation2 + $0xc] sm:$0xff]  ;;  %v1638_v14 = vpack.c.bf16 %v1637_v11, %v1636_v9 }
 0x3d6   : > { %v1619_v15 = vpack.c.bf16 %v1618_v13, %v1617_v12 }
 0x3d7   : > { %2561 = vmatmul.mubr.bf16.vlgmr.msra.gmra.mrb[20].mxu0 %v1638_v14 }
 0x3d8   : > { %2581 = vmatmul.mubr.bf16.vlgmr.msra.gmra.mrb[20].mxu1 %v1619_v15  ;;  %2585 = vmatpush3.bf16.msra.mxu0 %v2796_v10 }
 0x3d9   : > { %2600 = vmatprep.mubr.msk.bf16.mxu0 %vm3029_vm0, %v3417_v25  ;;  %2586 = vmatprep.subr.bf16.mxu0 %v3417_v25 }
 0x3dc   : > { %2587 = vmatpush3.bf16.msra.mxu0 %v2797_v17 }
 0x3dd   : > { %2588 = vmatprep.subr.bf16.mxu0 %v3417_v25 }
 0x3e0   : > { %2589 = vmatpush3.bf16.msra.mxu0 %v2798_v19 }
 0x3e1   : > { %2590 = vmatprep.subr.bf16.mxu0 %v3417_v25 }
 0x3e4   : > { %2591 = vmatpush3.bf16.msra.mxu0 %v2799_v20 }
 0x3e5   : > { %2592 = vmatprep.subr.bf16.mxu0 %v3417_v25 }
 0x3e8   : > { %2593 = vmatpush3.bf16.msra.mxu0 %v2800_v21 }
 0x3e9   : > { %2594 = vmatprep.subr.bf16.mxu0 %v3417_v25 }
 0x3ec   : > { %2595 = vmatpush3.bf16.msra.mxu0 %v2801_v22 }
 0x3ed   : > { %2596 = vmatprep.subr.bf16.mxu0 %v3417_v25 }
 0x3f0   : > { %2597 = vmatpush3.bf16.msra.mxu0 %v2802_v60 }
 0x3f1   : > { %2598 = vmatprep.subr.bf16.mxu0 %v3417_v25 }
 0x3f4   : > { %2599 = vmatpush3.bf16.msra.mxu0 %v2803_v23 }
 0x3f7   : > { %2601 = vmatmul.mubr.bf16.vlgmr.msra.gmra.mrb[24].mxu0 %v1836_v8 }
 0x4aa   : > { %v1738_v24 = vpop.f32.mrb[20].mxu0 }
 0x4ab   : > { %v1827_v1 = vpop.f32.mrb[20].mxu1  ;;  %v2562_v27 = vpop.f32.mrb[21].mxu0 }
 0x4ac   : > { %v1828_v26 = vadd.f32 %v1827_v1, %v1738_v24  ;;  %v2582_v28 = vpop.f32.mrb[21].mxu1  ;;  %v1741_v29 = vpop.f32.mrb[22].mxu0 }
 0x4ad   : > { %v1830_v30 = vpop.f32.mrb[22].mxu1  ;;  %v2563_v32 = vpop.f32.mrb[23].mxu0 }
 0x4ae   : > { %v1831_v31 = vadd.f32 %v1830_v30, %v1741_v29  ;;  %v2583_v33 = vpop.f32.mrb[23].mxu1 }
 0x4ca   : > { %v1936_v34 = vpop.f32.mrb[24].mxu0 }
 0x4cb   : > { %v1943_v25 = vadd.f32 %v1936_v34, %v1828_v26  ;;  %v2602_v36 = vpop.f32.mrb[25].mxu0 }
 0x4cc   : > { %v1939_v37 = vpop.f32.mrb[26].mxu0 }
 0x4cd   : > { %v1952_v38 = vadd.f32 %v2219_v35, %v1943_v25  ;;  %v1944_v39 = vadd.f32 %v1939_v37, %v1831_v31  ;;  %v2603_v40 = vpop.f32.mrb[27].mxu0 }
 0x4cf   : > { %v1954_v41 = vmax.f32 %v1952_v38, 0.0  ;;  %v1953_v42 = vadd.f32 %v2219_v35, %v1944_v39 }
 0x4d1   : > { %v1958_v43 = vadd.f32 %v1954_v41, %v3411_v16  ;;  %v1955_v44 = vmax.f32 %v1953_v42, 0.0 }
 0x4d3   : > { %v1960_v45 = vmax.f32 %v1958_v43, 0.0  ;;  %v1959_v46 = vadd.f32 %v1955_v44, %v3414_v18 }
 0x4d5   : > { %1962 = vst [vmem:[#allocation2 + $0x8] sm:$0xff] %v1960_v45  ;;  %v1961_v16 = vmax.f32 %v1959_v46, 0.0  ;;  %1966 = vst [vmem:[%s452_s23] sm:$0xff] %v1960_v45 }
 0x4d7   : > { %1963 = vst [vmem:[#allocation2 + $0x10] sm:$0xff] %v1961_v16  ;;  %1967 = vst [vmem:[%s452_s23 + $0x8] sm:$0xff] %v1961_v16 }
 0x4d8   : > { %2958 = shalt.err (!%p2955_p0)
}
 0x4d9   : > { %s2959_s30 = scalar_lea.hbm %s3472_s25, 256  ;;  %s2963_s19 = scalar_lea.hbm %s3560_s26, 512 }
 0x4da   : > { %p2960_p10 = scmp.ne.s32.totalorder %s3472_s25, %s2959_s30  ;;  %p2964_p4 = scmp.lt.u32.totalorder %s3472_s25, %s3560_s26 }
 0x4db   : > { %p2965_p12 = scmp.lt.u32.totalorder %s2963_s19, %s2959_s30  ;;  %p2967_p8 = scmp.lt.u32.totalorder %s2959_s30, %s3472_s25 }
 0x4dc   : > { %p2961_p2 = pnand %p2960_p10, %p3561_p11 }
 0x4dd   : > { %p2966_p7 = por %p2965_p12, %p2964_p4 }
 0x4de   : > { %p2962_p3 = pneg %p2961_p2 }
 0x4df   : > { %p2968_p13 = por %p2967_p8, %p2966_p7 }
 0x4e1   : > { %p2969_p1 = pnand %p2968_p13, %p2962_p3 }
 0x4e3   : > { %2972 = shalt.err (!%p2969_p1)
}
 0x4e4   : > { %s3031_s20 = smov 128   ;;  %s3032_s22 = smov 8  }
 0x4e5   : > { %2624 = dma.vmem_to_hbm [thread:$0]  (%p3561_p11), %s3474_s29, 256, %s3472_s25, %s3476_s21, %s3031_s20, %s3031_s20, %s3032_s22  }
 0x4e6 PF: > { %s3562_s23 = sld [smem:[#allocation20_spill]]  ;;  %s3563_s13 = sld [smem:[#allocation18_spill]] }
 0x4e7   : > { %s3564_s24 = sld [smem:[#allocation23_spill]] }
 0x4ec   : > { %p2656_p6 = scmp.ge.s32.totalorder %s3562_s23, 2  ;;  %s1997_s3 = sand.u32 1, %s3563_s13  }
 0x4ed   : > { %p3565_p9 = scmp.ne.s32.totalorder %s3564_s24, 0  ;;  %s1998_s11 = scalar_lea.sflag [#allocation6], %s1997_s3 }
 0x4ef   : > { %p2643_p5 = pnand %p2656_p6, %p3565_p9 }
 0x4f1   : > { %3002 = dma.done.wait (!%p2643_p5), %s1998_s11, 256  }
 0x4f2   : > { %3004 = vsyncadd (!%p2643_p5), %s1998_s11, 4294967040  ;;  %s3566_s20 = sld [smem:[#allocation21_spill]]  ;;  %s3567_s28 = sld [smem:[#allocation19_spill]] }
 0x4f3   : > { %s3568_s19 = sld [smem:[#allocation22_spill]]  ;;  %s3569_s17 = smov %s3011_s18 }
 0x4f8   : > { %p24_p0 = scmp.ge.s32.totalorder %s3566_s20, 4   ;;  %s3570_s18 = smov %s3567_s28 }
 0x4fa   :  { %26 = sbr.rel (!%p24_p0) target bundleno = 9 (0x9), region = 128 }
 0x501   :  { %2003 = vsyncpa [#allocation5], 1 }
 0x502   :  { %2005 = vsyncpa [#allocation5 + $0x1], 1 }
 0x503   :  { %2006 = vsyncpa [#allocation8], 1 }
 0x504   :  { %2007 = vsyncpa [#allocation11], 1 }
 0x505   :  { %2008 = vsyncpa [#allocation6], 1 }
 0x506   :  { %2010 = vsyncpa [#allocation6 + $0x1], 1 }

</bundles_post_ra>
